<compile_context>
chip_gen: v7x
topology: tpu7x:2x2x1
jax: 0.10.0
libtpu: 0.0.40
codegen_flags: <defaults>
</compile_context>

<pallas_src>
import jax
import jax.numpy as jnp
import numpy as np
from jax import lax
from jax.experimental import pallas as pl
from jax.experimental.pallas import tpu as pltpu

EPS = 1e-6  # LayerNorm(features, eps=1e-6)


# --------------------------------------------------------------------------
# Fused decoder-layer kernel
# --------------------------------------------------------------------------
def make_decoder_layer_kernel(n_heads, d_k, s_tgt, s_src, d_model):
    scale = float(1.0 / np.sqrt(d_k))

    def layer_norm(v, g, b):
        # f32 stats; unbiased std; divide by (std + eps) — matches the reference module.
        mean = jnp.mean(v, axis=-1, keepdims=True)
        cent = v - mean
        var = jnp.sum(cent * cent, axis=-1, keepdims=True) * (1.0 / (d_model - 1))
        inv = pl.reciprocal(jnp.sqrt(var) + EPS, approx=True)   # EUP; ok at test tolerance
        return g * cent * inv + b

    def split_heads(t):
        # (S, H*dk) -> (H, S, dk): static lane slices stacked on a new leading batch
        # axis.  Pure layout plumbing — no MXU work, no cross-lane transpose.
        return jnp.stack([t[:, h * d_k:(h + 1) * d_k] for h in range(n_heads)], axis=0)

    def attention(xq, xkv, mask2d, wq, bq, wkv, bkv, wo, bo):
        # Fused, full-lane-width projections: bf16 operands, f32 accumulation.
        q = jnp.dot(xq.astype(jnp.bfloat16), wq[...],
                    preferred_element_type=jnp.float32) + bq[...]          # (Sq, D)
        kv = jnp.dot(xkv.astype(jnp.bfloat16), wkv[...],
                     preferred_element_type=jnp.float32) + bkv[...]        # (Skv, 2D)
        k = kv[:, :d_model]
        v = kv[:, d_model:]

        qh = split_heads(q.astype(jnp.bfloat16))                           # (H, Sq, dk)
        kh = split_heads(k.astype(jnp.bfloat16))                           # (H, Skv, dk)
        vh = split_heads(v.astype(jnp.bfloat16))                           # (H, Skv, dk)

        # scores: contract last dim of both operands -> no K transpose (no vxpose).
        s = jnp.einsum('hqf,hkf->hqk', qh, kh,
                       preferred_element_type=jnp.float32) * scale
        s = jnp.where(mask2d[None, :, :], s, jnp.float32(-1e9))            # masked_fill
        s = s - jnp.max(s, axis=-1, keepdims=True)
        p = jnp.exp(s)
        p = p * pl.reciprocal(jnp.sum(p, axis=-1, keepdims=True), approx=True)

        o = jnp.einsum('hqk,hkf->hqf', p.astype(jnp.bfloat16), vh,
                       preferred_element_type=jnp.float32)                 # (H, Sq, dk)
        # fused output projection: concat(heads) (Sq, H*dk) @ Wo (D, D) — full MXU depth.
        o_cat = jnp.concatenate([o[h].astype(jnp.bfloat16) for h in range(n_heads)],
                                axis=-1)                                   # (Sq, D)
        return jnp.dot(o_cat, wo[...], preferred_element_type=jnp.float32) + bo[...]

    def kernel(lens_ref,                               # scalar prefetch (SMEM): src lengths (B,)
               x_ref, mem_ref,
               ln0g, ln0b, ln1g, ln1b, ln2g, ln2b,
               swq, sbq, swkv, sbkv, swo, sbo,         # self-attn (fused Wq / Wkv / Wo)
               cwq, cbq, cwkv, cbkv, cwo, cbo,         # cross-attn
               w1, b1, w2, b2,                         # FFN
               o_ref):
        b = pl.program_id(0)
        x = x_ref[0]        # (s_tgt, d_model) f32
        mem = mem_ref[0]    # (s_src, d_model) f32

        # in-kernel masks (no dense f32 mask DMA)
        row = lax.broadcasted_iota(jnp.int32, (s_tgt, s_tgt), 0)
        col = lax.broadcasted_iota(jnp.int32, (s_tgt, s_tgt), 1)
        tgt_mask = row >= col                                     # causal
        scol = lax.broadcasted_iota(jnp.int32, (s_tgt, s_src), 1)
        src_mask = scol < lens_ref[b]                             # per-batch valid length

        # sublayer 1: self-attention (+ residual, in-kernel)
        n0 = layer_norm(x, ln0g[...], ln0b[...])
        x = x + attention(n0, n0, tgt_mask, swq, sbq, swkv, sbkv, swo, sbo)

        # sublayer 2: cross-attention over memory (+ residual)
        n1 = layer_norm(x, ln1g[...], ln1b[...])
        x = x + attention(n1, mem, src_mask, cwq, cbq, cwkv, cbkv, cwo, cbo)

        # sublayer 3: position-wise FFN (+ residual)
        # TODO(synk): K-tile w1/w2 over a reduction grid axis + VMEM f32 accumulator for
        #             v7x (64 MiB VMEM) at realistic d_ff.
        n2 = layer_norm(x, ln2g[...], ln2b[...])
        h = jnp.maximum(
            jnp.dot(n2.astype(jnp.bfloat16), w1[...],
                    preferred_element_type=jnp.float32) + b1[...], 0.0)
        x = x + jnp.dot(h.astype(jnp.bfloat16), w2[...],
                        preferred_element_type=jnp.float32) + b2[...]

        o_ref[0] = x

    return kernel


# --------------------------------------------------------------------------
# Wrapper: weight layout plumbing (fused Wkv, bf16 weights) + single pallas_call
# --------------------------------------------------------------------------
def _pack_attn(p):
    """Fuse K/V weights into (D, 2D), keep biases lane-dense, cast weights to bf16."""
    wq = p["wq"].astype(jnp.bfloat16)
    wkv = jnp.concatenate([p["wk"], p["wv"]], axis=1).astype(jnp.bfloat16)   # (D, 2D)
    wo = p["wo"].astype(jnp.bfloat16)
    bq = p["bq"].reshape(1, -1)
    bkv = jnp.concatenate([p["bk"].reshape(1, -1), p["bv"].reshape(1, -1)], axis=1)
    bo = p["bo"].reshape(1, -1)
    return (wq, bq, wkv, bkv, wo, bo)


def decoder_layer(x, memory, src_lens, params, n_heads):
    """x: (B,St,D) f32; memory: (B,Ss,D) f32; src_lens: (B,) int32 valid source lengths.
    tgt mask is causal (built in-kernel)."""
    B, St, D = x.shape
    Ss = memory.shape[1]
    d_k = D // n_heads

    ln = (params["ln0_g"].reshape(1, D), params["ln0_b"].reshape(1, D),
          params["ln1_g"].reshape(1, D), params["ln1_b"].reshape(1, D),
          params["ln2_g"].reshape(1, D), params["ln2_b"].reshape(1, D))
    self_w = _pack_attn(params["self_attn"])
    src_w = _pack_attn(params["src_attn"])
    ffn = (params["ffn"]["w1"].astype(jnp.bfloat16), params["ffn"]["b1"].reshape(1, -1),
           params["ffn"]["w2"].astype(jnp.bfloat16), params["ffn"]["b2"].reshape(1, -1))
    operands = (x, memory) + ln + self_w + src_w + ffn

    def full_spec(arr):
        # Constant block index => each weight is DMA'd once and stays VMEM-resident.
        # TODO(synk): add pipeline_mode=pl.Buffered(1) for these grid-invariant operands
        #             to drop the second buffer at realistic sizes.
        zeros = (0,) * arr.ndim
        return pl.BlockSpec(arr.shape, lambda b, lens, z=zeros: z)

    in_specs = [
        pl.BlockSpec((1, St, D), lambda b, lens: (b, 0, 0)),
        pl.BlockSpec((1, Ss, D), lambda b, lens: (b, 0, 0)),
    ] + [full_spec(a) for a in operands[2:]]

    grid_spec = pltpu.PrefetchScalarGridSpec(
        num_scalar_prefetch=1,
        grid=(B,),
        in_specs=in_specs,
        out_specs=pl.BlockSpec((1, St, D), lambda b, lens: (b, 0, 0)),
    )

    kernel = make_decoder_layer_kernel(n_heads, d_k, St, Ss, D)
    return pl.pallas_call(
        kernel,
        out_shape=jax.ShapeDtypeStruct((B, St, D), jnp.float32),
        grid_spec=grid_spec,
        compiler_params=pltpu.CompilerParams(
            dimension_semantics=("parallel",),      # batch axis -> both TCs on megacore
            vmem_limit_bytes=48 * 1024 * 1024,      # above 16/32 MiB defaults, < v7x 64 MiB
        ),
    )(src_lens.astype(jnp.int32), *operands)


# --------------------------------------------------------------------------
# Pure-JAX reference (mirrors the PyTorch module semantics) for validation
# --------------------------------------------------------------------------
def ref_layernorm(x, g, b):
    mean = jnp.mean(x, axis=-1, keepdims=True)
    std = jnp.std(x, axis=-1, keepdims=True, ddof=1)
    return g * (x - mean) / (std + EPS) + b


def ref_mha(xq, xkv, mask, p, n_heads):
    B, Sq, D = xq.shape
    Skv = xkv.shape[1]
    d_k = D // n_heads
    q = (xq @ p["wq"] + p["bq"]).reshape(B, Sq, n_heads, d_k).transpose(0, 2, 1, 3)
    k = (xkv @ p["wk"] + p["bk"]).reshape(B, Skv, n_heads, d_k).transpose(0, 2, 1, 3)
    v = (xkv @ p["wv"] + p["bv"]).reshape(B, Skv, n_heads, d_k).transpose(0, 2, 1, 3)
    s = jnp.einsum("bhqd,bhkd->bhqk", q, k) / np.sqrt(d_k)
    s = jnp.where(mask[:, None, :, :] != 0, s, -1e9)
    a = jax.nn.softmax(s, axis=-1)
    o = jnp.einsum("bhqk,bhkd->bhqd", a, v).transpose(0, 2, 1, 3).reshape(B, Sq, D)
    return o @ p["wo"] + p["bo"]


def ref_decoder_layer(x, memory, src_mask, tgt_mask, params, n_heads):
    n0 = ref_layernorm(x, params["ln0_g"], params["ln0_b"])
    x = x + ref_mha(n0, n0, tgt_mask, params["self_attn"], n_heads)
    n1 = ref_layernorm(x, params["ln1_g"], params["ln1_b"])
    x = x + ref_mha(n1, memory, src_mask, params["src_attn"], n_heads)
    n2 = ref_layernorm(x, params["ln2_g"], params["ln2_b"])
    h = jnp.maximum(n2 @ params["ffn"]["w1"] + params["ffn"]["b1"], 0.0)
    return x + (h @ params["ffn"]["w2"] + params["ffn"]["b2"])


# --------------------------------------------------------------------------
def init_params(key, d_model, d_ff):
    ks = iter(jax.random.split(key, 32))

    def lin(i, o):
        return jax.random.normal(next(ks), (i, o), jnp.float32) * (1.0 / np.sqrt(i))

    def vec(n):
        return jax.random.normal(next(ks), (1, n), jnp.float32) * 0.1

    def gamma(n):
        return 1.0 + 0.1 * jax.random.normal(next(ks), (n,), jnp.float32)

    def beta(n):
        return 0.1 * jax.random.normal(next(ks), (n,), jnp.float32)

    def attn_params():
        return {"wq": lin(d_model, d_model), "bq": vec(d_model),
                "wk": lin(d_model, d_model), "bk": vec(d_model),
                "wv": lin(d_model, d_model), "bv": vec(d_model),
                "wo": lin(d_model, d_model), "bo": vec(d_model)}

    return {
        "ln0_g": gamma(d_model), "ln0_b": beta(d_model),
        "ln1_g": gamma(d_model), "ln1_b": beta(d_model),
        "ln2_g": gamma(d_model), "ln2_b": beta(d_model),
        "self_attn": attn_params(),
        "src_attn": attn_params(),
        "ffn": {"w1": lin(d_model, d_ff), "b1": vec(d_ff),
                "w2": lin(d_ff, d_model), "b2": vec(d_model)},
    }


if __name__ == "__main__":
    B, S_TGT, S_SRC, D, H, D_FF = 2, 8, 8, 32, 4, 64

    key = jax.random.PRNGKey(0)
    kx, km, kp = jax.random.split(key, 3)
    x = jax.random.normal(kx, (B, S_TGT, D), jnp.float32)
    memory = jax.random.normal(km, (B, S_SRC, D), jnp.float32)
    params = init_params(kp, D, D_FF)

    # per-batch valid source lengths (scalar-prefetched into SMEM by the kernel)
    src_lens = jnp.array([S_SRC, S_SRC - 2], jnp.int32)

    fused = jax.jit(decoder_layer, static_argnames=("n_heads",))
    out = fused(x, memory, src_lens, params, n_heads=H)
    out = jax.block_until_ready(out)

    # dense masks only for the pure-JAX reference
    tgt_mask = jnp.broadcast_to(
        jnp.tril(jnp.ones((S_TGT, S_TGT), jnp.float32)), (B, S_TGT, S_TGT))
    src_valid = (jnp.arange(S_SRC)[None, :] < src_lens[:, None]).astype(jnp.float32)
    src_mask = jnp.broadcast_to(src_valid[:, None, :], (B, S_TGT, S_SRC))
    ref = ref_decoder_layer(x, memory, src_mask, tgt_mask, params, H)

    assert out.shape == (B, S_TGT, D)
    # bf16 MXU operands (f32 accumulation) => slightly looser match than pure-f32
    np.testing.assert_allclose(np.asarray(out), np.asarray(ref), rtol=5e-2, atol=5e-2)

    print("KERNEL_OK")
</pallas_src>

<mosaic_0001>
module attributes {stable_mosaic.version = 11 : i64} {
  func.func @kernel(%arg0: i32, %arg1: memref<2xi32, #tpu.memory_space<smem>>, %arg2: memref<1x8x32xf32, #tpu.memory_space<vmem>>, %arg3: memref<1x8x32xf32, #tpu.memory_space<vmem>>, %arg4: memref<1x32xf32, #tpu.memory_space<vmem>>, %arg5: memref<1x32xf32, #tpu.memory_space<vmem>>, %arg6: memref<1x32xf32, #tpu.memory_space<vmem>>, %arg7: memref<1x32xf32, #tpu.memory_space<vmem>>, %arg8: memref<1x32xf32, #tpu.memory_space<vmem>>, %arg9: memref<1x32xf32, #tpu.memory_space<vmem>>, %arg10: memref<32x32xbf16, #tpu.memory_space<vmem>>, %arg11: memref<1x32xf32, #tpu.memory_space<vmem>>, %arg12: memref<32x64xbf16, #tpu.memory_space<vmem>>, %arg13: memref<1x64xf32, #tpu.memory_space<vmem>>, %arg14: memref<32x32xbf16, #tpu.memory_space<vmem>>, %arg15: memref<1x32xf32, #tpu.memory_space<vmem>>, %arg16: memref<32x32xbf16, #tpu.memory_space<vmem>>, %arg17: memref<1x32xf32, #tpu.memory_space<vmem>>, %arg18: memref<32x64xbf16, #tpu.memory_space<vmem>>, %arg19: memref<1x64xf32, #tpu.memory_space<vmem>>, %arg20: memref<32x32xbf16, #tpu.memory_space<vmem>>, %arg21: memref<1x32xf32, #tpu.memory_space<vmem>>, %arg22: memref<32x64xbf16, #tpu.memory_space<vmem>>, %arg23: memref<1x64xf32, #tpu.memory_space<vmem>>, %arg24: memref<64x32xbf16, #tpu.memory_space<vmem>>, %arg25: memref<1x32xf32, #tpu.memory_space<vmem>>, %arg26: memref<1x8x32xf32, #tpu.memory_space<vmem>>) attributes {dimension_semantics = [#tpu.dimension_semantics<parallel>], iteration_bounds = array<i64: 2>, scalar_prefetch = 1 : i64, scratch_operands = 0 : i64, tpu.core_type = #tpu.core_type<tc>, window_params = [{transform_indices = @transform_0, window_bounds = array<i64: 1, 8, 32>}, {transform_indices = @transform_1, window_bounds = array<i64: 1, 8, 32>}, {pipeline_mode = #tpu.pipeline_mode<synchronous>, transform_indices = @transform_2, window_bounds = array<i64: 1, 32>}, {pipeline_mode = #tpu.pipeline_mode<synchronous>, transform_indices = @transform_3, window_bounds = array<i64: 1, 32>}, {pipeline_mode = #tpu.pipeline_mode<synchronous>, transform_indices = @transform_4, window_bounds = array<i64: 1, 32>}, {pipeline_mode = #tpu.pipeline_mode<synchronous>, transform_indices = @transform_5, window_bounds = array<i64: 1, 32>}, {pipeline_mode = #tpu.pipeline_mode<synchronous>, transform_indices = @transform_6, window_bounds = array<i64: 1, 32>}, {pipeline_mode = #tpu.pipeline_mode<synchronous>, transform_indices = @transform_7, window_bounds = array<i64: 1, 32>}, {pipeline_mode = #tpu.pipeline_mode<synchronous>, transform_indices = @transform_8, window_bounds = array<i64: 32, 32>}, {pipeline_mode = #tpu.pipeline_mode<synchronous>, transform_indices = @transform_9, window_bounds = array<i64: 1, 32>}, {pipeline_mode = #tpu.pipeline_mode<synchronous>, transform_indices = @transform_10, window_bounds = array<i64: 32, 64>}, {pipeline_mode = #tpu.pipeline_mode<synchronous>, transform_indices = @transform_11, window_bounds = array<i64: 1, 64>}, {pipeline_mode = #tpu.pipeline_mode<synchronous>, transform_indices = @transform_12, window_bounds = array<i64: 32, 32>}, {pipeline_mode = #tpu.pipeline_mode<synchronous>, transform_indices = @transform_13, window_bounds = array<i64: 1, 32>}, {pipeline_mode = #tpu.pipeline_mode<synchronous>, transform_indices = @transform_14, window_bounds = array<i64: 32, 32>}, {pipeline_mode = #tpu.pipeline_mode<synchronous>, transform_indices = @transform_15, window_bounds = array<i64: 1, 32>}, {pipeline_mode = #tpu.pipeline_mode<synchronous>, transform_indices = @transform_16, window_bounds = array<i64: 32, 64>}, {pipeline_mode = #tpu.pipeline_mode<synchronous>, transform_indices = @transform_17, window_bounds = array<i64: 1, 64>}, {pipeline_mode = #tpu.pipeline_mode<synchronous>, transform_indices = @transform_18, window_bounds = array<i64: 32, 32>}, {pipeline_mode = #tpu.pipeline_mode<synchronous>, transform_indices = @transform_19, window_bounds = array<i64: 1, 32>}, {pipeline_mode = #tpu.pipeline_mode<synchronous>, transform_indices = @transform_20, window_bounds = array<i64: 32, 64>}, {pipeline_mode = #tpu.pipeline_mode<synchronous>, transform_indices = @transform_21, window_bounds = array<i64: 1, 64>}, {pipeline_mode = #tpu.pipeline_mode<synchronous>, transform_indices = @transform_22, window_bounds = array<i64: 64, 32>}, {pipeline_mode = #tpu.pipeline_mode<synchronous>, transform_indices = @transform_23, window_bounds = array<i64: 1, 32>}, {transform_indices = @transform_24, window_bounds = array<i64: 1, 8, 32>}]} {
    %c0 = arith.constant 0 : index
    %c0_0 = arith.constant 0 : index
    %c0_1 = arith.constant 0 : index
    %0 = vector.load %arg2[%c0, %c0_0, %c0_1] : memref<1x8x32xf32, #tpu.memory_space<vmem>>, vector<1x8x32xf32>
    %1 = vector.shape_cast %0 : vector<1x8x32xf32> to vector<8x32xf32>
    %c0_2 = arith.constant 0 : index
    %c0_3 = arith.constant 0 : index
    %c0_4 = arith.constant 0 : index
    %2 = vector.load %arg3[%c0_2, %c0_3, %c0_4] : memref<1x8x32xf32, #tpu.memory_space<vmem>>, vector<1x8x32xf32>
    %3 = vector.shape_cast %2 : vector<1x8x32xf32> to vector<8x32xf32>
    %4 = tpu.iota {dimensions = array<i32: 0>} : vector<8x8xi32>
    %5 = tpu.iota {dimensions = array<i32: 1>} : vector<8x8xi32>
    %6 = arith.cmpi sge, %4, %5 : vector<8x8xi32>
    %7 = tpu.iota {dimensions = array<i32: 1>} : vector<8x8xi32>
    %8 = arith.index_cast %arg0 : i32 to index
    %9 = memref.load %arg1[%8] : memref<2xi32, #tpu.memory_space<smem>>
    %10 = vector.broadcast %9 : i32 to vector<8x8xi32>
    %11 = arith.cmpi slt, %7, %10 : vector<8x8xi32>
    %c0_5 = arith.constant 0 : index
    %c0_6 = arith.constant 0 : index
    %12 = vector.load %arg4[%c0_5, %c0_6] : memref<1x32xf32, #tpu.memory_space<vmem>>, vector<1x32xf32>
    %c0_7 = arith.constant 0 : index
    %c0_8 = arith.constant 0 : index
    %13 = vector.load %arg5[%c0_7, %c0_8] : memref<1x32xf32, #tpu.memory_space<vmem>>, vector<1x32xf32>
    %cst = arith.constant dense<0.000000e+00> : vector<8xf32>
    %14 = vector.multi_reduction <add>, %1, %cst [1] : vector<8x32xf32> to vector<8xf32>
    %15 = vector.shape_cast %14 : vector<8xf32> to vector<8x1xf32>
    %cst_9 = arith.constant 3.200000e+01 : f32
    %16 = vector.broadcast %cst_9 : f32 to vector<8x1xf32>
    %17 = arith.divf %15, %16 : vector<8x1xf32>
    %18 = vector.broadcast %17 : vector<8x1xf32> to vector<8x32xf32>
    %19 = arith.subf %1, %18 : vector<8x32xf32>
    %20 = arith.mulf %19, %19 : vector<8x32xf32>
    %cst_10 = arith.constant dense<0.000000e+00> : vector<8xf32>
    %21 = vector.multi_reduction <add>, %20, %cst_10 [1] : vector<8x32xf32> to vector<8xf32>
    %22 = vector.shape_cast %21 : vector<8xf32> to vector<8x1xf32>
    %cst_11 = arith.constant 0.0322580636 : f32
    %23 = vector.broadcast %cst_11 : f32 to vector<8x1xf32>
    %24 = arith.mulf %22, %23 : vector<8x1xf32>
    %25 = math.sqrt %24 : vector<8x1xf32>
    %cst_12 = arith.constant 9.99999997E-7 : f32
    %26 = vector.broadcast %cst_12 : f32 to vector<8x1xf32>
    %27 = arith.addf %25, %26 : vector<8x1xf32>
    %28 = tpu.reciprocal %27 {approx = true} : vector<8x1xf32> -> vector<8x1xf32>
    %29 = vector.broadcast %12 : vector<1x32xf32> to vector<8x32xf32>
    %30 = arith.mulf %29, %19 : vector<8x32xf32>
    %31 = vector.broadcast %28 : vector<8x1xf32> to vector<8x32xf32>
    %32 = arith.mulf %30, %31 : vector<8x32xf32>
    %33 = vector.broadcast %13 : vector<1x32xf32> to vector<8x32xf32>
    %34 = arith.addf %32, %33 : vector<8x32xf32>
    %35 = arith.truncf %34 : vector<8x32xf32> to vector<8x32xbf16>
    %c0_13 = arith.constant 0 : index
    %c0_14 = arith.constant 0 : index
    %36 = vector.load %arg10[%c0_13, %c0_14] : memref<32x32xbf16, #tpu.memory_space<vmem>>, vector<32x32xbf16>
    %cst_15 = arith.constant dense<0.000000e+00> : vector<8x32xf32>
    %37 = tpu.matmul %35, %36, %cst_15 {dimension_numbers = #tpu.dot_dimension_numbers<[1], [0], [0], [1], [0, 0, 1, 1], [], []>} : vector<8x32xbf16>, vector<32x32xbf16>, vector<8x32xf32> -> vector<8x32xf32>
    %c0_16 = arith.constant 0 : index
    %c0_17 = arith.constant 0 : index
    %38 = vector.load %arg11[%c0_16, %c0_17] : memref<1x32xf32, #tpu.memory_space<vmem>>, vector<1x32xf32>
    %39 = vector.broadcast %38 : vector<1x32xf32> to vector<8x32xf32>
    %40 = arith.addf %37, %39 : vector<8x32xf32>
    %41 = arith.truncf %34 : vector<8x32xf32> to vector<8x32xbf16>
    %c0_18 = arith.constant 0 : index
    %c0_19 = arith.constant 0 : index
    %42 = vector.load %arg12[%c0_18, %c0_19] : memref<32x64xbf16, #tpu.memory_space<vmem>>, vector<32x64xbf16>
    %cst_20 = arith.constant dense<0.000000e+00> : vector<8x64xf32>
    %43 = tpu.matmul %41, %42, %cst_20 {dimension_numbers = #tpu.dot_dimension_numbers<[1], [0], [0], [1], [0, 0, 1, 1], [], []>} : vector<8x32xbf16>, vector<32x64xbf16>, vector<8x64xf32> -> vector<8x64xf32>
    %c0_21 = arith.constant 0 : index
    %c0_22 = arith.constant 0 : index
    %44 = vector.load %arg13[%c0_21, %c0_22] : memref<1x64xf32, #tpu.memory_space<vmem>>, vector<1x64xf32>
    %45 = vector.broadcast %44 : vector<1x64xf32> to vector<8x64xf32>
    %46 = arith.addf %43, %45 : vector<8x64xf32>
    %47 = vector.extract_strided_slice %46 {offsets = [0, 0], sizes = [8, 32], strides = [1, 1]} : vector<8x64xf32> to vector<8x32xf32>
    %48 = vector.extract_strided_slice %46 {offsets = [0, 32], sizes = [8, 32], strides = [1, 1]} : vector<8x64xf32> to vector<8x32xf32>
    %49 = arith.truncf %40 : vector<8x32xf32> to vector<8x32xbf16>
    %50 = vector.extract_strided_slice %49 {offsets = [0, 0], sizes = [8, 8], strides = [1, 1]} : vector<8x32xbf16> to vector<8x8xbf16>
    %51 = vector.extract_strided_slice %49 {offsets = [0, 8], sizes = [8, 8], strides = [1, 1]} : vector<8x32xbf16> to vector<8x8xbf16>
    %52 = vector.extract_strided_slice %49 {offsets = [0, 16], sizes = [8, 8], strides = [1, 1]} : vector<8x32xbf16> to vector<8x8xbf16>
    %53 = vector.extract_strided_slice %49 {offsets = [0, 24], sizes = [8, 8], strides = [1, 1]} : vector<8x32xbf16> to vector<8x8xbf16>
    %54 = vector.shape_cast %50 : vector<8x8xbf16> to vector<1x8x8xbf16>
    %55 = vector.shape_cast %51 : vector<8x8xbf16> to vector<1x8x8xbf16>
    %56 = vector.shape_cast %52 : vector<8x8xbf16> to vector<1x8x8xbf16>
    %57 = vector.shape_cast %53 : vector<8x8xbf16> to vector<1x8x8xbf16>
    %58 = tpu.concatenate %54, %55, %56, %57 in 0 : vector<1x8x8xbf16>, vector<1x8x8xbf16>, vector<1x8x8xbf16>, vector<1x8x8xbf16> -> vector<4x8x8xbf16>
    %59 = arith.truncf %47 : vector<8x32xf32> to vector<8x32xbf16>
    %60 = vector.extract_strided_slice %59 {offsets = [0, 0], sizes = [8, 8], strides = [1, 1]} : vector<8x32xbf16> to vector<8x8xbf16>
    %61 = vector.extract_strided_slice %59 {offsets = [0, 8], sizes = [8, 8], strides = [1, 1]} : vector<8x32xbf16> to vector<8x8xbf16>
    %62 = vector.extract_strided_slice %59 {offsets = [0, 16], sizes = [8, 8], strides = [1, 1]} : vector<8x32xbf16> to vector<8x8xbf16>
    %63 = vector.extract_strided_slice %59 {offsets = [0, 24], sizes = [8, 8], strides = [1, 1]} : vector<8x32xbf16> to vector<8x8xbf16>
    %64 = vector.shape_cast %60 : vector<8x8xbf16> to vector<1x8x8xbf16>
    %65 = vector.shape_cast %61 : vector<8x8xbf16> to vector<1x8x8xbf16>
    %66 = vector.shape_cast %62 : vector<8x8xbf16> to vector<1x8x8xbf16>
    %67 = vector.shape_cast %63 : vector<8x8xbf16> to vector<1x8x8xbf16>
    %68 = tpu.concatenate %64, %65, %66, %67 in 0 : vector<1x8x8xbf16>, vector<1x8x8xbf16>, vector<1x8x8xbf16>, vector<1x8x8xbf16> -> vector<4x8x8xbf16>
    %69 = arith.truncf %48 : vector<8x32xf32> to vector<8x32xbf16>
    %70 = vector.extract_strided_slice %69 {offsets = [0, 0], sizes = [8, 8], strides = [1, 1]} : vector<8x32xbf16> to vector<8x8xbf16>
    %71 = vector.extract_strided_slice %69 {offsets = [0, 8], sizes = [8, 8], strides = [1, 1]} : vector<8x32xbf16> to vector<8x8xbf16>
    %72 = vector.extract_strided_slice %69 {offsets = [0, 16], sizes = [8, 8], strides = [1, 1]} : vector<8x32xbf16> to vector<8x8xbf16>
    %73 = vector.extract_strided_slice %69 {offsets = [0, 24], sizes = [8, 8], strides = [1, 1]} : vector<8x32xbf16> to vector<8x8xbf16>
    %74 = vector.shape_cast %70 : vector<8x8xbf16> to vector<1x8x8xbf16>
    %75 = vector.shape_cast %71 : vector<8x8xbf16> to vector<1x8x8xbf16>
    %76 = vector.shape_cast %72 : vector<8x8xbf16> to vector<1x8x8xbf16>
    %77 = vector.shape_cast %73 : vector<8x8xbf16> to vector<1x8x8xbf16>
    %78 = tpu.concatenate %74, %75, %76, %77 in 0 : vector<1x8x8xbf16>, vector<1x8x8xbf16>, vector<1x8x8xbf16>, vector<1x8x8xbf16> -> vector<4x8x8xbf16>
    "tpu.trace_start"() <{level = 10 : i32, message = "hqf,hkf->hqk"}> : () -> ()
    %cst_23 = arith.constant dense<0.000000e+00> : vector<4x8x8xf32>
    %79 = tpu.matmul %58, %68, %cst_23 {dimension_numbers = #tpu.dot_dimension_numbers<[2], [2], [1], [1], [0, 0, 0, 1, 1, 1], [0], [0]>} : vector<4x8x8xbf16>, vector<4x8x8xbf16>, vector<4x8x8xf32> -> vector<4x8x8xf32>
    "tpu.trace_stop"() : () -> ()
    %cst_24 = arith.constant 0.353553385 : f32
    %80 = vector.broadcast %cst_24 : f32 to vector<4x8x8xf32>
    %81 = arith.mulf %79, %80 : vector<4x8x8xf32>
    %82 = vector.shape_cast %6 : vector<8x8xi1> to vector<1x8x8xi1>
    %cst_25 = arith.constant -1.000000e+09 : f32
    %83 = vector.shape_cast %82 : vector<1x8x8xi1> to vector<1x8x8xi1>
    %84 = vector.broadcast %83 : vector<1x8x8xi1> to vector<4x8x8xi1>
    %85 = vector.broadcast %cst_25 : f32 to vector<4x8x8xf32>
    %86 = arith.select %84, %81, %85 : vector<4x8x8xi1>, vector<4x8x8xf32>
    %cst_26 = arith.constant dense<0xFF800000> : vector<4x8xf32>
    %87 = vector.multi_reduction <maximumf>, %86, %cst_26 [2] : vector<4x8x8xf32> to vector<4x8xf32>
    %88 = vector.shape_cast %87 : vector<4x8xf32> to vector<4x8x1xf32>
    %89 = vector.broadcast %88 : vector<4x8x1xf32> to vector<4x8x8xf32>
    %90 = arith.subf %86, %89 : vector<4x8x8xf32>
    %91 = math.exp %90 : vector<4x8x8xf32>
    %cst_27 = arith.constant dense<0.000000e+00> : vector<4x8xf32>
    %92 = vector.multi_reduction <add>, %91, %cst_27 [2] : vector<4x8x8xf32> to vector<4x8xf32>
    %93 = vector.shape_cast %92 : vector<4x8xf32> to vector<4x8x1xf32>
    %94 = tpu.reciprocal %93 {approx = true} : vector<4x8x1xf32> -> vector<4x8x1xf32>
    %95 = vector.broadcast %94 : vector<4x8x1xf32> to vector<4x8x8xf32>
    %96 = arith.mulf %91, %95 : vector<4x8x8xf32>
    %97 = arith.truncf %96 : vector<4x8x8xf32> to vector<4x8x8xbf16>
    "tpu.trace_start"() <{level = 10 : i32, message = "hqk,hkf->hqf"}> : () -> ()
    %cst_28 = arith.constant dense<0.000000e+00> : vector<4x8x8xf32>
    %98 = tpu.matmul %97, %78, %cst_28 {dimension_numbers = #tpu.dot_dimension_numbers<[2], [1], [1], [2], [0, 0, 0, 1, 1, 2], [0], [0]>} : vector<4x8x8xbf16>, vector<4x8x8xbf16>, vector<4x8x8xf32> -> vector<4x8x8xf32>
    "tpu.trace_stop"() : () -> ()
    %99 = vector.extract_strided_slice %98 {offsets = [0, 0, 0], sizes = [1, 8, 8], strides = [1, 1, 1]} : vector<4x8x8xf32> to vector<1x8x8xf32>
    %100 = vector.shape_cast %99 : vector<1x8x8xf32> to vector<8x8xf32>
    %101 = arith.truncf %100 : vector<8x8xf32> to vector<8x8xbf16>
    %102 = vector.extract_strided_slice %98 {offsets = [1, 0, 0], sizes = [1, 8, 8], strides = [1, 1, 1]} : vector<4x8x8xf32> to vector<1x8x8xf32>
    %103 = vector.shape_cast %102 : vector<1x8x8xf32> to vector<8x8xf32>
    %104 = arith.truncf %103 : vector<8x8xf32> to vector<8x8xbf16>
    %105 = vector.extract_strided_slice %98 {offsets = [2, 0, 0], sizes = [1, 8, 8], strides = [1, 1, 1]} : vector<4x8x8xf32> to vector<1x8x8xf32>
    %106 = vector.shape_cast %105 : vector<1x8x8xf32> to vector<8x8xf32>
    %107 = arith.truncf %106 : vector<8x8xf32> to vector<8x8xbf16>
    %108 = vector.extract_strided_slice %98 {offsets = [3, 0, 0], sizes = [1, 8, 8], strides = [1, 1, 1]} : vector<4x8x8xf32> to vector<1x8x8xf32>
    %109 = vector.shape_cast %108 : vector<1x8x8xf32> to vector<8x8xf32>
    %110 = arith.truncf %109 : vector<8x8xf32> to vector<8x8xbf16>
    %111 = tpu.concatenate %101, %104, %107, %110 in 1 : vector<8x8xbf16>, vector<8x8xbf16>, vector<8x8xbf16>, vector<8x8xbf16> -> vector<8x32xbf16>
    %c0_29 = arith.constant 0 : index
    %c0_30 = arith.constant 0 : index
    %112 = vector.load %arg14[%c0_29, %c0_30] : memref<32x32xbf16, #tpu.memory_space<vmem>>, vector<32x32xbf16>
    %cst_31 = arith.constant dense<0.000000e+00> : vector<8x32xf32>
    %113 = tpu.matmul %111, %112, %cst_31 {dimension_numbers = #tpu.dot_dimension_numbers<[1], [0], [0], [1], [0, 0, 1, 1], [], []>} : vector<8x32xbf16>, vector<32x32xbf16>, vector<8x32xf32> -> vector<8x32xf32>
    %c0_32 = arith.constant 0 : index
    %c0_33 = arith.constant 0 : index
    %114 = vector.load %arg15[%c0_32, %c0_33] : memref<1x32xf32, #tpu.memory_space<vmem>>, vector<1x32xf32>
    %115 = vector.broadcast %114 : vector<1x32xf32> to vector<8x32xf32>
    %116 = arith.addf %113, %115 : vector<8x32xf32>
    %117 = arith.addf %1, %116 : vector<8x32xf32>
    %c0_34 = arith.constant 0 : index
    %c0_35 = arith.constant 0 : index
    %118 = vector.load %arg6[%c0_34, %c0_35] : memref<1x32xf32, #tpu.memory_space<vmem>>, vector<1x32xf32>
    %c0_36 = arith.constant 0 : index
    %c0_37 = arith.constant 0 : index
    %119 = vector.load %arg7[%c0_36, %c0_37] : memref<1x32xf32, #tpu.memory_space<vmem>>, vector<1x32xf32>
    %cst_38 = arith.constant dense<0.000000e+00> : vector<8xf32>
    %120 = vector.multi_reduction <add>, %117, %cst_38 [1] : vector<8x32xf32> to vector<8xf32>
    %121 = vector.shape_cast %120 : vector<8xf32> to vector<8x1xf32>
    %cst_39 = arith.constant 3.200000e+01 : f32
    %122 = vector.broadcast %cst_39 : f32 to vector<8x1xf32>
    %123 = arith.divf %121, %122 : vector<8x1xf32>
    %124 = vector.broadcast %123 : vector<8x1xf32> to vector<8x32xf32>
    %125 = arith.subf %117, %124 : vector<8x32xf32>
    %126 = arith.mulf %125, %125 : vector<8x32xf32>
    %cst_40 = arith.constant dense<0.000000e+00> : vector<8xf32>
    %127 = vector.multi_reduction <add>, %126, %cst_40 [1] : vector<8x32xf32> to vector<8xf32>
    %128 = vector.shape_cast %127 : vector<8xf32> to vector<8x1xf32>
    %cst_41 = arith.constant 0.0322580636 : f32
    %129 = vector.broadcast %cst_41 : f32 to vector<8x1xf32>
    %130 = arith.mulf %128, %129 : vector<8x1xf32>
    %131 = math.sqrt %130 : vector<8x1xf32>
    %cst_42 = arith.constant 9.99999997E-7 : f32
    %132 = vector.broadcast %cst_42 : f32 to vector<8x1xf32>
    %133 = arith.addf %131, %132 : vector<8x1xf32>
    %134 = tpu.reciprocal %133 {approx = true} : vector<8x1xf32> -> vector<8x1xf32>
    %135 = vector.broadcast %118 : vector<1x32xf32> to vector<8x32xf32>
    %136 = arith.mulf %135, %125 : vector<8x32xf32>
    %137 = vector.broadcast %134 : vector<8x1xf32> to vector<8x32xf32>
    %138 = arith.mulf %136, %137 : vector<8x32xf32>
    %139 = vector.broadcast %119 : vector<1x32xf32> to vector<8x32xf32>
    %140 = arith.addf %138, %139 : vector<8x32xf32>
    %141 = arith.truncf %140 : vector<8x32xf32> to vector<8x32xbf16>
    %c0_43 = arith.constant 0 : index
    %c0_44 = arith.constant 0 : index
    %142 = vector.load %arg16[%c0_43, %c0_44] : memref<32x32xbf16, #tpu.memory_space<vmem>>, vector<32x32xbf16>
    %cst_45 = arith.constant dense<0.000000e+00> : vector<8x32xf32>
    %143 = tpu.matmul %141, %142, %cst_45 {dimension_numbers = #tpu.dot_dimension_numbers<[1], [0], [0], [1], [0, 0, 1, 1], [], []>} : vector<8x32xbf16>, vector<32x32xbf16>, vector<8x32xf32> -> vector<8x32xf32>
    %c0_46 = arith.constant 0 : index
    %c0_47 = arith.constant 0 : index
    %144 = vector.load %arg17[%c0_46, %c0_47] : memref<1x32xf32, #tpu.memory_space<vmem>>, vector<1x32xf32>
    %145 = vector.broadcast %144 : vector<1x32xf32> to vector<8x32xf32>
    %146 = arith.addf %143, %145 : vector<8x32xf32>
    %147 = arith.truncf %3 : vector<8x32xf32> to vector<8x32xbf16>
    %c0_48 = arith.constant 0 : index
    %c0_49 = arith.constant 0 : index
    %148 = vector.load %arg18[%c0_48, %c0_49] : memref<32x64xbf16, #tpu.memory_space<vmem>>, vector<32x64xbf16>
    %cst_50 = arith.constant dense<0.000000e+00> : vector<8x64xf32>
    %149 = tpu.matmul %147, %148, %cst_50 {dimension_numbers = #tpu.dot_dimension_numbers<[1], [0], [0], [1], [0, 0, 1, 1], [], []>} : vector<8x32xbf16>, vector<32x64xbf16>, vector<8x64xf32> -> vector<8x64xf32>
    %c0_51 = arith.constant 0 : index
    %c0_52 = arith.constant 0 : index
    %150 = vector.load %arg19[%c0_51, %c0_52] : memref<1x64xf32, #tpu.memory_space<vmem>>, vector<1x64xf32>
    %151 = vector.broadcast %150 : vector<1x64xf32> to vector<8x64xf32>
    %152 = arith.addf %149, %151 : vector<8x64xf32>
    %153 = vector.extract_strided_slice %152 {offsets = [0, 0], sizes = [8, 32], strides = [1, 1]} : vector<8x64xf32> to vector<8x32xf32>
    %154 = vector.extract_strided_slice %152 {offsets = [0, 32], sizes = [8, 32], strides = [1, 1]} : vector<8x64xf32> to vector<8x32xf32>
    %155 = arith.truncf %146 : vector<8x32xf32> to vector<8x32xbf16>
    %156 = vector.extract_strided_slice %155 {offsets = [0, 0], sizes = [8, 8], strides = [1, 1]} : vector<8x32xbf16> to vector<8x8xbf16>
    %157 = vector.extract_strided_slice %155 {offsets = [0, 8], sizes = [8, 8], strides = [1, 1]} : vector<8x32xbf16> to vector<8x8xbf16>
    %158 = vector.extract_strided_slice %155 {offsets = [0, 16], sizes = [8, 8], strides = [1, 1]} : vector<8x32xbf16> to vector<8x8xbf16>
    %159 = vector.extract_strided_slice %155 {offsets = [0, 24], sizes = [8, 8], strides = [1, 1]} : vector<8x32xbf16> to vector<8x8xbf16>
    %160 = vector.shape_cast %156 : vector<8x8xbf16> to vector<1x8x8xbf16>
    %161 = vector.shape_cast %157 : vector<8x8xbf16> to vector<1x8x8xbf16>
    %162 = vector.shape_cast %158 : vector<8x8xbf16> to vector<1x8x8xbf16>
    %163 = vector.shape_cast %159 : vector<8x8xbf16> to vector<1x8x8xbf16>
    %164 = tpu.concatenate %160, %161, %162, %163 in 0 : vector<1x8x8xbf16>, vector<1x8x8xbf16>, vector<1x8x8xbf16>, vector<1x8x8xbf16> -> vector<4x8x8xbf16>
    %165 = arith.truncf %153 : vector<8x32xf32> to vector<8x32xbf16>
    %166 = vector.extract_strided_slice %165 {offsets = [0, 0], sizes = [8, 8], strides = [1, 1]} : vector<8x32xbf16> to vector<8x8xbf16>
    %167 = vector.extract_strided_slice %165 {offsets = [0, 8], sizes = [8, 8], strides = [1, 1]} : vector<8x32xbf16> to vector<8x8xbf16>
    %168 = vector.extract_strided_slice %165 {offsets = [0, 16], sizes = [8, 8], strides = [1, 1]} : vector<8x32xbf16> to vector<8x8xbf16>
    %169 = vector.extract_strided_slice %165 {offsets = [0, 24], sizes = [8, 8], strides = [1, 1]} : vector<8x32xbf16> to vector<8x8xbf16>
    %170 = vector.shape_cast %166 : vector<8x8xbf16> to vector<1x8x8xbf16>
    %171 = vector.shape_cast %167 : vector<8x8xbf16> to vector<1x8x8xbf16>
    %172 = vector.shape_cast %168 : vector<8x8xbf16> to vector<1x8x8xbf16>
    %173 = vector.shape_cast %169 : vector<8x8xbf16> to vector<1x8x8xbf16>
    %174 = tpu.concatenate %170, %171, %172, %173 in 0 : vector<1x8x8xbf16>, vector<1x8x8xbf16>, vector<1x8x8xbf16>, vector<1x8x8xbf16> -> vector<4x8x8xbf16>
    %175 = arith.truncf %154 : vector<8x32xf32> to vector<8x32xbf16>
    %176 = vector.extract_strided_slice %175 {offsets = [0, 0], sizes = [8, 8], strides = [1, 1]} : vector<8x32xbf16> to vector<8x8xbf16>
    %177 = vector.extract_strided_slice %175 {offsets = [0, 8], sizes = [8, 8], strides = [1, 1]} : vector<8x32xbf16> to vector<8x8xbf16>
    %178 = vector.extract_strided_slice %175 {offsets = [0, 16], sizes = [8, 8], strides = [1, 1]} : vector<8x32xbf16> to vector<8x8xbf16>
    %179 = vector.extract_strided_slice %175 {offsets = [0, 24], sizes = [8, 8], strides = [1, 1]} : vector<8x32xbf16> to vector<8x8xbf16>
    %180 = vector.shape_cast %176 : vector<8x8xbf16> to vector<1x8x8xbf16>
    %181 = vector.shape_cast %177 : vector<8x8xbf16> to vector<1x8x8xbf16>
    %182 = vector.shape_cast %178 : vector<8x8xbf16> to vector<1x8x8xbf16>
    %183 = vector.shape_cast %179 : vector<8x8xbf16> to vector<1x8x8xbf16>
    %184 = tpu.concatenate %180, %181, %182, %183 in 0 : vector<1x8x8xbf16>, vector<1x8x8xbf16>, vector<1x8x8xbf16>, vector<1x8x8xbf16> -> vector<4x8x8xbf16>
    "tpu.trace_start"() <{level = 10 : i32, message = "hqf,hkf->hqk"}> : () -> ()
    %cst_53 = arith.constant dense<0.000000e+00> : vector<4x8x8xf32>
    %185 = tpu.matmul %164, %174, %cst_53 {dimension_numbers = #tpu.dot_dimension_numbers<[2], [2], [1], [1], [0, 0, 0, 1, 1, 1], [0], [0]>} : vector<4x8x8xbf16>, vector<4x8x8xbf16>, vector<4x8x8xf32> -> vector<4x8x8xf32>
    "tpu.trace_stop"() : () -> ()
    %cst_54 = arith.constant 0.353553385 : f32
    %186 = vector.broadcast %cst_54 : f32 to vector<4x8x8xf32>
    %187 = arith.mulf %185, %186 : vector<4x8x8xf32>
    %188 = vector.shape_cast %11 : vector<8x8xi1> to vector<1x8x8xi1>
    %cst_55 = arith.constant -1.000000e+09 : f32
    %189 = vector.shape_cast %188 : vector<1x8x8xi1> to vector<1x8x8xi1>
    %190 = vector.broadcast %189 : vector<1x8x8xi1> to vector<4x8x8xi1>
    %191 = vector.broadcast %cst_55 : f32 to vector<4x8x8xf32>
    %192 = arith.select %190, %187, %191 : vector<4x8x8xi1>, vector<4x8x8xf32>
    %cst_56 = arith.constant dense<0xFF800000> : vector<4x8xf32>
    %193 = vector.multi_reduction <maximumf>, %192, %cst_56 [2] : vector<4x8x8xf32> to vector<4x8xf32>
    %194 = vector.shape_cast %193 : vector<4x8xf32> to vector<4x8x1xf32>
    %195 = vector.broadcast %194 : vector<4x8x1xf32> to vector<4x8x8xf32>
    %196 = arith.subf %192, %195 : vector<4x8x8xf32>
    %197 = math.exp %196 : vector<4x8x8xf32>
    %cst_57 = arith.constant dense<0.000000e+00> : vector<4x8xf32>
    %198 = vector.multi_reduction <add>, %197, %cst_57 [2] : vector<4x8x8xf32> to vector<4x8xf32>
    %199 = vector.shape_cast %198 : vector<4x8xf32> to vector<4x8x1xf32>
    %200 = tpu.reciprocal %199 {approx = true} : vector<4x8x1xf32> -> vector<4x8x1xf32>
    %201 = vector.broadcast %200 : vector<4x8x1xf32> to vector<4x8x8xf32>
    %202 = arith.mulf %197, %201 : vector<4x8x8xf32>
    %203 = arith.truncf %202 : vector<4x8x8xf32> to vector<4x8x8xbf16>
    "tpu.trace_start"() <{level = 10 : i32, message = "hqk,hkf->hqf"}> : () -> ()
    %cst_58 = arith.constant dense<0.000000e+00> : vector<4x8x8xf32>
    %204 = tpu.matmul %203, %184, %cst_58 {dimension_numbers = #tpu.dot_dimension_numbers<[2], [1], [1], [2], [0, 0, 0, 1, 1, 2], [0], [0]>} : vector<4x8x8xbf16>, vector<4x8x8xbf16>, vector<4x8x8xf32> -> vector<4x8x8xf32>
    "tpu.trace_stop"() : () -> ()
    %205 = vector.extract_strided_slice %204 {offsets = [0, 0, 0], sizes = [1, 8, 8], strides = [1, 1, 1]} : vector<4x8x8xf32> to vector<1x8x8xf32>
    %206 = vector.shape_cast %205 : vector<1x8x8xf32> to vector<8x8xf32>
    %207 = arith.truncf %206 : vector<8x8xf32> to vector<8x8xbf16>
    %208 = vector.extract_strided_slice %204 {offsets = [1, 0, 0], sizes = [1, 8, 8], strides = [1, 1, 1]} : vector<4x8x8xf32> to vector<1x8x8xf32>
    %209 = vector.shape_cast %208 : vector<1x8x8xf32> to vector<8x8xf32>
    %210 = arith.truncf %209 : vector<8x8xf32> to vector<8x8xbf16>
    %211 = vector.extract_strided_slice %204 {offsets = [2, 0, 0], sizes = [1, 8, 8], strides = [1, 1, 1]} : vector<4x8x8xf32> to vector<1x8x8xf32>
    %212 = vector.shape_cast %211 : vector<1x8x8xf32> to vector<8x8xf32>
    %213 = arith.truncf %212 : vector<8x8xf32> to vector<8x8xbf16>
    %214 = vector.extract_strided_slice %204 {offsets = [3, 0, 0], sizes = [1, 8, 8], strides = [1, 1, 1]} : vector<4x8x8xf32> to vector<1x8x8xf32>
    %215 = vector.shape_cast %214 : vector<1x8x8xf32> to vector<8x8xf32>
    %216 = arith.truncf %215 : vector<8x8xf32> to vector<8x8xbf16>
    %217 = tpu.concatenate %207, %210, %213, %216 in 1 : vector<8x8xbf16>, vector<8x8xbf16>, vector<8x8xbf16>, vector<8x8xbf16> -> vector<8x32xbf16>
    %c0_59 = arith.constant 0 : index
    %c0_60 = arith.constant 0 : index
    %218 = vector.load %arg20[%c0_59, %c0_60] : memref<32x32xbf16, #tpu.memory_space<vmem>>, vector<32x32xbf16>
    %cst_61 = arith.constant dense<0.000000e+00> : vector<8x32xf32>
    %219 = tpu.matmul %217, %218, %cst_61 {dimension_numbers = #tpu.dot_dimension_numbers<[1], [0], [0], [1], [0, 0, 1, 1], [], []>} : vector<8x32xbf16>, vector<32x32xbf16>, vector<8x32xf32> -> vector<8x32xf32>
    %c0_62 = arith.constant 0 : index
    %c0_63 = arith.constant 0 : index
    %220 = vector.load %arg21[%c0_62, %c0_63] : memref<1x32xf32, #tpu.memory_space<vmem>>, vector<1x32xf32>
    %221 = vector.broadcast %220 : vector<1x32xf32> to vector<8x32xf32>
    %222 = arith.addf %219, %221 : vector<8x32xf32>
    %223 = arith.addf %117, %222 : vector<8x32xf32>
    %c0_64 = arith.constant 0 : index
    %c0_65 = arith.constant 0 : index
    %224 = vector.load %arg8[%c0_64, %c0_65] : memref<1x32xf32, #tpu.memory_space<vmem>>, vector<1x32xf32>
    %c0_66 = arith.constant 0 : index
    %c0_67 = arith.constant 0 : index
    %225 = vector.load %arg9[%c0_66, %c0_67] : memref<1x32xf32, #tpu.memory_space<vmem>>, vector<1x32xf32>
    %cst_68 = arith.constant dense<0.000000e+00> : vector<8xf32>
    %226 = vector.multi_reduction <add>, %223, %cst_68 [1] : vector<8x32xf32> to vector<8xf32>
    %227 = vector.shape_cast %226 : vector<8xf32> to vector<8x1xf32>
    %cst_69 = arith.constant 3.200000e+01 : f32
    %228 = vector.broadcast %cst_69 : f32 to vector<8x1xf32>
    %229 = arith.divf %227, %228 : vector<8x1xf32>
    %230 = vector.broadcast %229 : vector<8x1xf32> to vector<8x32xf32>
    %231 = arith.subf %223, %230 : vector<8x32xf32>
    %232 = arith.mulf %231, %231 : vector<8x32xf32>
    %cst_70 = arith.constant dense<0.000000e+00> : vector<8xf32>
    %233 = vector.multi_reduction <add>, %232, %cst_70 [1] : vector<8x32xf32> to vector<8xf32>
    %234 = vector.shape_cast %233 : vector<8xf32> to vector<8x1xf32>
    %cst_71 = arith.constant 0.0322580636 : f32
    %235 = vector.broadcast %cst_71 : f32 to vector<8x1xf32>
    %236 = arith.mulf %234, %235 : vector<8x1xf32>
    %237 = math.sqrt %236 : vector<8x1xf32>
    %cst_72 = arith.constant 9.99999997E-7 : f32
    %238 = vector.broadcast %cst_72 : f32 to vector<8x1xf32>
    %239 = arith.addf %237, %238 : vector<8x1xf32>
    %240 = tpu.reciprocal %239 {approx = true} : vector<8x1xf32> -> vector<8x1xf32>
    %241 = vector.broadcast %224 : vector<1x32xf32> to vector<8x32xf32>
    %242 = arith.mulf %241, %231 : vector<8x32xf32>
    %243 = vector.broadcast %240 : vector<8x1xf32> to vector<8x32xf32>
    %244 = arith.mulf %242, %243 : vector<8x32xf32>
    %245 = vector.broadcast %225 : vector<1x32xf32> to vector<8x32xf32>
    %246 = arith.addf %244, %245 : vector<8x32xf32>
    %247 = arith.truncf %246 : vector<8x32xf32> to vector<8x32xbf16>
    %c0_73 = arith.constant 0 : index
    %c0_74 = arith.constant 0 : index
    %248 = vector.load %arg22[%c0_73, %c0_74] : memref<32x64xbf16, #tpu.memory_space<vmem>>, vector<32x64xbf16>
    %cst_75 = arith.constant dense<0.000000e+00> : vector<8x64xf32>
    %249 = tpu.matmul %247, %248, %cst_75 {dimension_numbers = #tpu.dot_dimension_numbers<[1], [0], [0], [1], [0, 0, 1, 1], [], []>} : vector<8x32xbf16>, vector<32x64xbf16>, vector<8x64xf32> -> vector<8x64xf32>
    %c0_76 = arith.constant 0 : index
    %c0_77 = arith.constant 0 : index
    %250 = vector.load %arg23[%c0_76, %c0_77] : memref<1x64xf32, #tpu.memory_space<vmem>>, vector<1x64xf32>
    %251 = vector.broadcast %250 : vector<1x64xf32> to vector<8x64xf32>
    %252 = arith.addf %249, %251 : vector<8x64xf32>
    %cst_78 = arith.constant 0.000000e+00 : f32
    %253 = vector.broadcast %cst_78 : f32 to vector<8x64xf32>
    %254 = arith.maximumf %252, %253 : vector<8x64xf32>
    %255 = arith.truncf %254 : vector<8x64xf32> to vector<8x64xbf16>
    %c0_79 = arith.constant 0 : index
    %c0_80 = arith.constant 0 : index
    %256 = vector.load %arg24[%c0_79, %c0_80] : memref<64x32xbf16, #tpu.memory_space<vmem>>, vector<64x32xbf16>
    %cst_81 = arith.constant dense<0.000000e+00> : vector<8x32xf32>
    %257 = tpu.matmul %255, %256, %cst_81 {dimension_numbers = #tpu.dot_dimension_numbers<[1], [0], [0], [1], [0, 0, 1, 1], [], []>} : vector<8x64xbf16>, vector<64x32xbf16>, vector<8x32xf32> -> vector<8x32xf32>
    %258 = arith.addf %223, %257 : vector<8x32xf32>
    %c0_82 = arith.constant 0 : index
    %c0_83 = arith.constant 0 : index
    %259 = vector.load %arg25[%c0_82, %c0_83] : memref<1x32xf32, #tpu.memory_space<vmem>>, vector<1x32xf32>
    %260 = vector.broadcast %259 : vector<1x32xf32> to vector<8x32xf32>
    %261 = arith.addf %258, %260 : vector<8x32xf32>
    %c0_84 = arith.constant 0 : index
    %c0_85 = arith.constant 0 : index
    %c0_86 = arith.constant 0 : index
    %262 = vector.load %arg26[%c0_84, %c0_85, %c0_86] : memref<1x8x32xf32, #tpu.memory_space<vmem>>, vector<1x8x32xf32>
    %263 = vector.shape_cast %262 : vector<1x8x32xf32> to vector<8x32xf32>
    %264 = vector.shape_cast %261 : vector<8x32xf32> to vector<1x8x32xf32>
    tpu.vector_store %arg26[%c0_84, %c0_85, %c0_86], %264 {strides = array<i32>} : memref<1x8x32xf32, #tpu.memory_space<vmem>>, vector<1x8x32xf32>,
    return
  }
  func.func @transform_0(%arg0: i32, %arg1: memref<2xi32, #tpu.memory_space<smem>>) -> (i32, i32, i32) {
    %c0_i32 = arith.constant 0 : i32
    %c0_i32_0 = arith.constant 0 : i32
    %c0_i32_1 = arith.constant 0 : i32
    return %arg0, %c0_i32, %c0_i32_0 : i32, i32, i32
  }
  func.func @transform_1(%arg0: i32, %arg1: memref<2xi32, #tpu.memory_space<smem>>) -> (i32, i32, i32) {
    %c0_i32 = arith.constant 0 : i32
    %c0_i32_0 = arith.constant 0 : i32
    %c0_i32_1 = arith.constant 0 : i32
    return %arg0, %c0_i32, %c0_i32_0 : i32, i32, i32
  }
  func.func @transform_2(%arg0: i32, %arg1: memref<2xi32, #tpu.memory_space<smem>>) -> (i32, i32) {
    %c0_i32 = arith.constant 0 : i32
    %c0_i32_0 = arith.constant 0 : i32
    %c0_i32_1 = arith.constant 0 : i32
    return %c0_i32, %c0_i32_0 : i32, i32
  }
  func.func @transform_3(%arg0: i32, %arg1: memref<2xi32, #tpu.memory_space<smem>>) -> (i32, i32) {
    %c0_i32 = arith.constant 0 : i32
    %c0_i32_0 = arith.constant 0 : i32
    %c0_i32_1 = arith.constant 0 : i32
    return %c0_i32, %c0_i32_0 : i32, i32
  }
  func.func @transform_4(%arg0: i32, %arg1: memref<2xi32, #tpu.memory_space<smem>>) -> (i32, i32) {
    %c0_i32 = arith.constant 0 : i32
    %c0_i32_0 = arith.constant 0 : i32
    %c0_i32_1 = arith.constant 0 : i32
    return %c0_i32, %c0_i32_0 : i32, i32
  }
  func.func @transform_5(%arg0: i32, %arg1: memref<2xi32, #tpu.memory_space<smem>>) -> (i32, i32) {
    %c0_i32 = arith.constant 0 : i32
    %c0_i32_0 = arith.constant 0 : i32
    %c0_i32_1 = arith.constant 0 : i32
    return %c0_i32, %c0_i32_0 : i32, i32
  }
  func.func @transform_6(%arg0: i32, %arg1: memref<2xi32, #tpu.memory_space<smem>>) -> (i32, i32) {
    %c0_i32 = arith.constant 0 : i32
    %c0_i32_0 = arith.constant 0 : i32
    %c0_i32_1 = arith.constant 0 : i32
    return %c0_i32, %c0_i32_0 : i32, i32
  }
  func.func @transform_7(%arg0: i32, %arg1: memref<2xi32, #tpu.memory_space<smem>>) -> (i32, i32) {
    %c0_i32 = arith.constant 0 : i32
    %c0_i32_0 = arith.constant 0 : i32
    %c0_i32_1 = arith.constant 0 : i32
    return %c0_i32, %c0_i32_0 : i32, i32
  }
  func.func @transform_8(%arg0: i32, %arg1: memref<2xi32, #tpu.memory_space<smem>>) -> (i32, i32) {
    %c0_i32 = arith.constant 0 : i32
    %c0_i32_0 = arith.constant 0 : i32
    %c0_i32_1 = arith.constant 0 : i32
    return %c0_i32, %c0_i32_0 : i32, i32
  }
  func.func @transform_9(%arg0: i32, %arg1: memref<2xi32, #tpu.memory_space<smem>>) -> (i32, i32) {
    %c0_i32 = arith.constant 0 : i32
    %c0_i32_0 = arith.constant 0 : i32
    %c0_i32_1 = arith.constant 0 : i32
    return %c0_i32, %c0_i32_0 : i32, i32
  }
  func.func @transform_10(%arg0: i32, %arg1: memref<2xi32, #tpu.memory_space<smem>>) -> (i32, i32) {
    %c0_i32 = arith.constant 0 : i32
    %c0_i32_0 = arith.constant 0 : i32
    %c0_i32_1 = arith.constant 0 : i32
    return %c0_i32, %c0_i32_0 : i32, i32
  }
  func.func @transform_11(%arg0: i32, %arg1: memref<2xi32, #tpu.memory_space<smem>>) -> (i32, i32) {
    %c0_i32 = arith.constant 0 : i32
    %c0_i32_0 = arith.constant 0 : i32
    %c0_i32_1 = arith.constant 0 : i32
    return %c0_i32, %c0_i32_0 : i32, i32
  }
  func.func @transform_12(%arg0: i32, %arg1: memref<2xi32, #tpu.memory_space<smem>>) -> (i32, i32) {
    %c0_i32 = arith.constant 0 : i32
    %c0_i32_0 = arith.constant 0 : i32
    %c0_i32_1 = arith.constant 0 : i32
    return %c0_i32, %c0_i32_0 : i32, i32
  }
  func.func @transform_13(%arg0: i32, %arg1: memref<2xi32, #tpu.memory_space<smem>>) -> (i32, i32) {
    %c0_i32 = arith.constant 0 : i32
    %c0_i32_0 = arith.constant 0 : i32
    %c0_i32_1 = arith.constant 0 : i32
    return %c0_i32, %c0_i32_0 : i32, i32
  }
  func.func @transform_14(%arg0: i32, %arg1: memref<2xi32, #tpu.memory_space<smem>>) -> (i32, i32) {
    %c0_i32 = arith.constant 0 : i32
    %c0_i32_0 = arith.constant 0 : i32
    %c0_i32_1 = arith.constant 0 : i32
    return %c0_i32, %c0_i32_0 : i32, i32
  }
  func.func @transform_15(%arg0: i32, %arg1: memref<2xi32, #tpu.memory_space<smem>>) -> (i32, i32) {
    %c0_i32 = arith.constant 0 : i32
    %c0_i32_0 = arith.constant 0 : i32
    %c0_i32_1 = arith.constant 0 : i32
    return %c0_i32, %c0_i32_0 : i32, i32
  }
  func.func @transform_16(%arg0: i32, %arg1: memref<2xi32, #tpu.memory_space<smem>>) -> (i32, i32) {
    %c0_i32 = arith.constant 0 : i32
    %c0_i32_0 = arith.constant 0 : i32
    %c0_i32_1 = arith.constant 0 : i32
    return %c0_i32, %c0_i32_0 : i32, i32
  }
  func.func @transform_17(%arg0: i32, %arg1: memref<2xi32, #tpu.memory_space<smem>>) -> (i32, i32) {
    %c0_i32 = arith.constant 0 : i32
    %c0_i32_0 = arith.constant 0 : i32
    %c0_i32_1 = arith.constant 0 : i32
    return %c0_i32, %c0_i32_0 : i32, i32
  }
  func.func @transform_18(%arg0: i32, %arg1: memref<2xi32, #tpu.memory_space<smem>>) -> (i32, i32) {
    %c0_i32 = arith.constant 0 : i32
    %c0_i32_0 = arith.constant 0 : i32
    %c0_i32_1 = arith.constant 0 : i32
    return %c0_i32, %c0_i32_0 : i32, i32
  }
  func.func @transform_19(%arg0: i32, %arg1: memref<2xi32, #tpu.memory_space<smem>>) -> (i32, i32) {
    %c0_i32 = arith.constant 0 : i32
    %c0_i32_0 = arith.constant 0 : i32
    %c0_i32_1 = arith.constant 0 : i32
    return %c0_i32, %c0_i32_0 : i32, i32
  }
  func.func @transform_20(%arg0: i32, %arg1: memref<2xi32, #tpu.memory_space<smem>>) -> (i32, i32) {
    %c0_i32 = arith.constant 0 : i32
    %c0_i32_0 = arith.constant 0 : i32
    %c0_i32_1 = arith.constant 0 : i32
    return %c0_i32, %c0_i32_0 : i32, i32
  }
  func.func @transform_21(%arg0: i32, %arg1: memref<2xi32, #tpu.memory_space<smem>>) -> (i32, i32) {
    %c0_i32 = arith.constant 0 : i32
    %c0_i32_0 = arith.constant 0 : i32
    %c0_i32_1 = arith.constant 0 : i32
    return %c0_i32, %c0_i32_0 : i32, i32
  }
  func.func @transform_22(%arg0: i32, %arg1: memref<2xi32, #tpu.memory_space<smem>>) -> (i32, i32) {
    %c0_i32 = arith.constant 0 : i32
    %c0_i32_0 = arith.constant 0 : i32
    %c0_i32_1 = arith.constant 0 : i32
    return %c0_i32, %c0_i32_0 : i32, i32
  }
  func.func @transform_23(%arg0: i32, %arg1: memref<2xi32, #tpu.memory_space<smem>>) -> (i32, i32) {
    %c0_i32 = arith.constant 0 : i32
    %c0_i32_0 = arith.constant 0 : i32
    %c0_i32_1 = arith.constant 0 : i32
    return %c0_i32, %c0_i32_0 : i32, i32
  }
  func.func @transform_24(%arg0: i32, %arg1: memref<2xi32, #tpu.memory_space<smem>>) -> (i32, i32, i32) {
    %c0_i32 = arith.constant 0 : i32
    %c0_i32_0 = arith.constant 0 : i32
    %c0_i32_1 = arith.constant 0 : i32
    return %arg0, %c0_i32, %c0_i32_0 : i32, i32, i32
  }
}

</mosaic_0001>

<bundles_post_ra>
// kernel: decoder_layer.1
= control target key start
LH: loop header
LB: loop body
LE: loop exit
PB: predicated region body
PF: predicated region fallthrough
CT: control target
= control target key end

     0   :  { %s3536_s0 = inlined_call_operand.vmem [shape: s32[2], index: 0, kind: input, shape index: {}]   ;;  %s3537_s1 = inlined_call_operand.vmem [shape: f32[2,8,32], index: 1, kind: input, shape index: {}]   ;;  %s3538_s2 = inlined_call_operand.vmem [shape: f32[2,8,32], index: 2, kind: input, shape index: {}]   ;;  %s3539_s3 = inlined_call_operand.vmem [shape: f32[1,32], index: 3, kind: input, shape index: {}]   ;;  %s3540_s4 = inlined_call_operand.vmem [shape: f32[1,32], index: 4, kind: input, shape index: {}]   ;;  %s3541_s5 = inlined_call_operand.vmem [shape: f32[1,32], index: 5, kind: input, shape index: {}]   ;;  %s3542_s6 = inlined_call_operand.vmem [shape: f32[1,32], index: 6, kind: input, shape index: {}]   ;;  %s3543_s7 = inlined_call_operand.vmem [shape: f32[1,32], index: 7, kind: input, shape index: {}]   ;;  %s3544_s8 = inlined_call_operand.vmem [shape: f32[1,32], index: 8, kind: input, shape index: {}]   ;;  %s3545_s9 = inlined_call_operand.vmem [shape: bf16[32,32], index: 9, kind: input, shape index: {}]   ;;  %s3546_s10 = inlined_call_operand.vmem [shape: f32[1,32], index: 10, kind: input, shape index: {}]   ;;  %s3547_s11 = inlined_call_operand.vmem [shape: bf16[32,64], index: 11, kind: input, shape index: {}]   ;;  %s3548_s12 = inlined_call_operand.vmem [shape: f32[1,64], index: 12, kind: input, shape index: {}]   ;;  %s3549_s13 = inlined_call_operand.vmem [shape: bf16[32,32], index: 13, kind: input, shape index: {}]   ;;  %s3550_s14 = inlined_call_operand.vmem [shape: f32[1,32], index: 14, kind: input, shape index: {}]   ;;  %s3551_s15 = inlined_call_operand.vmem [shape: bf16[32,32], index: 15, kind: input, shape index: {}]   ;;  %s3552_s16 = inlined_call_operand.vmem [shape: f32[1,32], index: 16, kind: input, shape index: {}]   ;;  %s3553_s17 = inlined_call_operand.vmem [shape: bf16[32,64], index: 17, kind: input, shape index: {}]   ;;  %s3554_s18 = inlined_call_operand.vmem [shape: f32[1,64], index: 18, kind: input, shape index: {}]   ;;  %s3555_s19 = inlined_call_operand.vmem [shape: bf16[32,32], index: 19, kind: input, shape index: {}]   ;;  %s3556_s20 = inlined_call_operand.vmem [shape: f32[1,32], index: 20, kind: input, shape index: {}]   ;;  %s3557_s21 = inlined_call_operand.vmem [shape: bf16[32,64], index: 21, kind: input, shape index: {}]   ;;  %s3558_s22 = inlined_call_operand.vmem [shape: f32[1,64], index: 22, kind: input, shape index: {}]   ;;  %s3559_s23 = inlined_call_operand.vmem [shape: bf16[64,32], index: 23, kind: input, shape index: {}]   ;;  %s3560_s24 = inlined_call_operand.vmem [shape: f32[1,32], index: 24, kind: input, shape index: {}]   ;;  %s3561_s25 = inlined_call_operand.hbm [shape: f32[2,8,32], index: 25, kind: output, shape index: {}]  }
   0x1   :  { %3581 = sst [smem:[#allocation12_spill]] %s3536_s0 }
   0x2   :  { %3582 = sst [smem:[#allocation13_spill]] %s3537_s1 }
   0x3   :  { %3583 = sst [smem:[#allocation14_spill]] %s3538_s2 }
   0x4   :  { %3584 = sst [smem:[#allocation15_spill]] %s3539_s3 }
   0x5   :  { %3585 = sst [smem:[#allocation16_spill]] %s3540_s4 }
   0x6   :  { %3586 = sst [smem:[#allocation17_spill]] %s3541_s5 }
   0x7   :  { %3587 = sst [smem:[#allocation18_spill]] %s3542_s6  ;;  %s3593_s6 = sld [smem:[#allocation12_spill]] }
   0x8   :  { %3588 = sst [smem:[#allocation19_spill]] %s3543_s7 }
   0x9   :  { %3589 = sst [smem:[#allocation20_spill]] %s3544_s8 }
   0xa   :  { %3590 = sst [smem:[#allocation21_spill]] %s3545_s9 }
   0xb   :  { %3591 = sst [smem:[#allocation22_spill]] %s3546_s10 }
   0xc   :  { %3592 = sst [smem:[#allocation23_spill]] %s3555_s19 }
   0xd   :  { %s30_s19 = sshll.u32 %s3593_s6, 4  ;;  %s31_s19 = int_to_ptr.vmem [resolvable:$true] %s30_s19 }
   0xe   :  { %s2858_s30 = scalar_lea.vmem %s31_s19, 16  ;;  %p2863_p1 = scmp.lt.s32.totalorder %s31_s19, %s31_s19 }
   0xf   :  { %p2859_p0 = scmp.ne.s32.totalorder %s31_s19, %s2858_s30  ;;  %p2864_p2 = scmp.lt.s32.totalorder %s2858_s30, %s2858_s30 }
  0x11   :  { %p2865_p3 = por %p2864_p2, %p2863_p1 }
  0x13   :  { %p2866_p4 = pnand %p2865_p3, %p2859_p0 }
  0x15   :  { %2869 = shalt.err (!%p2866_p4)  }
  0x16   :  { %s2936_s7 = smov [#allocation3]  }
  0x17   :  { %33 = dma.vmem_to_smem %s31_s19, 16, %s2936_s7, [#allocation2] }
  0x18   :  { %2914 = dma.done.wait [#allocation2], 16 }
  0x19   :  { %2915 = vsyncadd [#allocation2], 4294967280 }
  0x1a   :  { %35 = sfence }
  0x1b   :  { %36 = vsyncpa [#allocation5], 0 }
  0x1c   :  { %38 = vsyncpa [#allocation5 + $0x1], 0  ;;  %s3080_s3 = smov 0   ;;  %s3082_s26 = smov 0  }
  0x1d   :  { %s3084_s1 = smov 0   ;;  %s3086_s8 = smov 0  }
  0x1e LB: > { %3594 = sst [smem:[#allocation8_spill]] %s2930_s1  ;;  %s3101_s19 = sadd.s32 4294967295, %s2934_s8   ;;  %s2934_s8 = sphi %s3086_s8, %s3623_s8   ;;  %s2930_s1 = sphi %s3084_s1, %s3625_s1   ;;  %s2926_s26 = sphi %s3082_s26, %s3627_s26   ;;  %s2922_s3 = sphi %s3080_s3, %s3626_s3  }
  0x1f   : > { %s2458_s27 = sadd.s32 4294967294, %s2934_s8   ;;  %s3105_s4 = sadd.s32 1, %s2934_s8  }
  0x20   : > { %3595 = sst [smem:[#allocation9_spill]] %s3105_s4  ;;  %s565_s28 = sadd.s32 1, %s2930_s1 }
  0x21   : > { %s562_s9 = ssub.s32 %s2934_s8, %s3105_s4  ;;  %p575_p5 = scmp.ne.s32.totalorder %s2930_s1, %s2926_s26 }
  0x22   : > { %p563_p6 = scmp.eq.s32.totalorder %s562_s9, 0  ;;  %p576_p7 = scmp.eq.s32.totalorder %s3101_s19, 1 }
  0x23   : > { %p581_p8 = scmp.ne.s32.totalorder %s2926_s26, %s2922_s3  ;;  %p582_p9 = scmp.eq.s32.totalorder %s2458_s27, 1 }
  0x24   : > { %s3116_s5 = scalar_select %p563_p6, %s2930_s1, %s565_s28  }
  0x25   : > { %p3118_p10 = por %p576_p7, %p575_p5  ;;  %p3122_p11 = por %p582_p9, %p581_p8 }
  0x26   : > { %3596 = sst [smem:[#allocation10_spill]] %s3116_s5  ;;  %p2461_p12 = scmp.ge.s32.totalorder %s2934_s8, 1 }
  0x27   : > { %s3598_s29 = scalar_select %p3122_p11, 1, 0 }
  0x28   : > { %p680_p13 = scmp.lt.s32.totalorder %s2934_s8, 3 }
  0x29   : > { %3599 = sst [smem:[#allocation11_spill]] %s3598_s29 }
  0x2a   : > { %p681_p0 = pnand %p2461_p12, %p680_p13 }
  0x2b   : > { %p749_p1 = scmp.lt.s32.totalorder (!%p681_p0), %s3101_s19, 1  ;;  %vm770_vm0 = vcmask (!%p681_p0), 261120   ;;  %s3600_s27 = sld [smem:[#allocation13_spill]] (!%p681_p0)  ;;  %v2797_v8 = vld [vmem:[%s3547_s11] sm:$0xff] (!%p681_p0)   ;;  %v2937_v9 = vmov (!%p681_p0), 0.0   ;;  %v2799_v11 = vld [vmem:[%s3547_s11 + $0x8] sm:$0xff] (!%p681_p0)   ;;  %v760_v51 = vlaneseq (!%p681_p0) }
  0x2c   : > { %684 = sbr.rel (%p681_p0) target bundleno = 4329 (0x10e9), region = 116  ;;  %s3601_s1 = sld [smem:[#allocation21_spill]] (!%p681_p0)  ;;  %2583 = vmatprep.subr.bf16.mxu0 (!%p681_p0), %v2937_v9  ;;  %2591 = vmatprep.subr.bf16.mxu1 (!%p681_p0), %v2937_v9  ;;  %vm2938_vm1 = vmmov (!%p681_p0), 0   ;;  %v2471_v28 = vld [vmem:[%s3548_s12] ss:$0 sm:$0xff] (!%p681_p0)  ;;  %vm952_vm4 = vcmask (!%p681_p0), 64512  }
  0x2d   : > { %2592 = vmatpush3.bf16.msra.mxu1 (!%p681_p0), %v2797_v8  ;;  %2587 = vmatprep.mubr.msk.bf16.mxu0 (!%p681_p0), %vm2938_vm1, %v2937_v9  ;;  %s3603_s29 = sld [smem:[#allocation15_spill]] (!%p681_p0)  ;;  %s3604_s30 = sld [smem:[#allocation16_spill]] (!%p681_p0)  ;;  %v761_v52 = vshrl.u32 (!%p681_p0), %v760_v51, 7  ;;  %v3222_v53 = vand.u32 (!%p681_p0), 127, %v760_v51  ;;  %vm1200_vm6 = vcmask (!%p681_p0), 1043456   ;;  %vm1404_vm7 = vcmask (!%p681_p0), 130048  }
  0x2e   : > { %2593 = vmatprep.subr.bf16.mxu1 (!%p681_p0), %v2937_v9  ;;  %2595 = vmatprep.mubr.msk.bf16.mxu1 (!%p681_p0), %vm2938_vm1, %v2937_v9  ;;  %s3605_s10 = sld [smem:[#allocation22_spill]] (!%p681_p0)  ;;  %s3576_s5 = smov (!%p681_p0), 120   ;;  %vm1407_vm8 = vcmask (!%p681_p0), 195584   ;;  %vm2319_vm14 = vcmask (!%p681_p0), 523264  }
  0x2f   : > { %vm764_vm5 = vcmp.ge.s32.totalorder (!%p681_p0), %v761_v52, %v3222_v53  ;;  %s3572_s9 = smov (!%p681_p0), 96   ;;  %s3569_s7 = smov (!%p681_p0), 24  }
  0x31   : > { %2594 = vmatpush3.bf16.msra.mxu1 (!%p681_p0), %v2799_v11 }
  0x32   : > { %s3602_s4 = smov (!%p681_p0), %s3601_s1  ;;  %v2796_v7 = vld [vmem:[%s3601_s1] sm:$0xff] (!%p681_p0)   ;;  %2605 = vmatprep.subr.bf16.mxu1 (!%p681_p0), %v2937_v9  ;;  %s3571_s1 = smov (!%p681_p0), 8  }
  0x33   : > { %s3130_s2 = scalar_select %p749_p1, %s3101_s19, 1  ;;  %2584 = vmatpush3.bf16.msra.mxu0 %v2796_v7  ;;  %v2798_v10 = vld [vmem:[%s3602_s4 + $0x8] sm:$0xff]   ;;  %v2465_v20 = vld [vmem:[%s3603_s29] ss:$0 sm:$0xff] }
  0x34   : > { %2585 = vmatprep.subr.bf16.mxu0 %v2937_v9  ;;  %v2466_v23 = vld [vmem:[%s3604_s30] ss:$0 sm:$0xff]  ;;  %s3578_s29 = smov 112   ;;  %s3570_s30 = smov 16  }
  0x35   : > { %s3567_s6 = sshll.u32 %s3130_s2, 3  ;;  %v2467_v27 = vld [vmem:[%s3605_s10] ss:$0 sm:$0xff]  ;;  %s765_s4 = sld [smem:[#allocation3 + %s3101_s19]] }
  0x36   : > { %s752_s28 = scalar_lea.vmem %s3600_s27, %s3567_s6  ;;  %s3574_s6 = smov 104  }
  0x37   : > { %v3138_v0 = vld [vmem:[%s752_s28] sm:$0xff]  ;;  %2586 = vmatpush3.bf16.msra.mxu0 %v2798_v10  ;;  %s3606_s27 = sshll.u32 %s3130_s2, 3  ;;  %s3611_s28 = smov 120  }
  0x38   : > { %v771_v1 = vsel %vm770_vm0, %v3138_v0, 0.0  ;;  %2599 = vmatprep.subr.bf16.mxu0 %v2937_v9  ;;  %s3612_s2 = smov 104   ;;  %s3620_s10 = sld [smem:[#allocation19_spill]] }
  0x39   : > { %772 = vadd.xlane.f32.xlu0 %v771_v1 }
  0xc6   : > { %v773_v2 = vpop.xlane.xlu0 %772 }
  0xc7   : > { %v775_v3 = vmul.f32 0.03125, %v773_v2 }
  0xc9   : > { %v776_v4 = vsub.f32 %v3138_v0, %v775_v3 }
  0xcb   : > { %v777_v5 = vmul.f32 %v776_v4, %v776_v4  ;;  %v797_v21 = vmul.f32 %v2465_v20, %v776_v4 }
  0xcd   : > { %v778_v6 = vsel %vm770_vm0, %v777_v5, 0.0 }
  0xce   : > { %779 = vadd.xlane.f32.xlu0 %v778_v6 }
 0x15b   : > { %v780_v12 = vpop.xlane.xlu0 %779 }
 0x15c   : > { %v781_v13 = vmul.f32 0.032258064, %v780_v12 }
 0x15e   : > { %2814 = vrsqrt.f32 %v781_v13  ;;  %vm784_vm2 = vcmp.eq.f32.partialorder %v781_v13, inf  ;;  %v787_v16 = vand.u32 2147483648, %v781_v13  ;;  %vm786_vm3 = vcmp.eq.f32.partialorder %v781_v13, 0.0 }
 0x168   : > { %v2815_v14 = vpop.eup %2814 }
 0x169   : > { %v783_v15 = vmul.f32 %v2815_v14, %v781_v13 }
 0x16b   : > { %v785_v17 = vsel %vm784_vm2, %v781_v13, %v783_v15 }
 0x16c   : > { %v788_v18 = vsel %vm786_vm3, %v787_v16, %v785_v17 }
 0x16d   : > { %v789_v19 = vadd.f32 1e-06, %v788_v18 }
 0x16f   : > { %2816 = vrcp.f32 %v789_v19 }
 0x179   : > { %v2817_v22 = vpop.eup %2816 }
 0x17a   : > { %v798_v24 = vmul.f32 %v2817_v22, %v797_v21 }
 0x17c   : > { %v805_v25 = vadd.f32 %v2466_v23, %v798_v24 }
 0x17e   : > { %v806_v26 = vpack.c.bf16 %v805_v25, %v805_v25 }
 0x180   : > { %2588 = vmatmul.mubr.msk.bf16.vlgmr.msra.gmra.mrb[0].mxu0 %vm770_vm0, %v806_v26  ;;  %2596 = vmatmul.mubr.msk.bf16.vlgmr.msra.gmra.mrb[0].mxu1 %vm770_vm0, %v806_v26 }
 0x181   : > { %2601 = vmatprep.mubr.msk.bf16.mxu0 %vm2938_vm1, %v2937_v9  ;;  %2607 = vmatprep.mubr.msk.bf16.mxu1 %vm2938_vm1, %v2937_v9 }
 0x253   : > { %v867_v29 = vpop.f32.mrb[0].mxu0  ;;  %v930_v30 = vpop.f32.mrb[0].mxu1 }
 0x254   : > { %v868_v31 = vadd.f32 %v2467_v27, %v867_v29  ;;  %v931_v32 = vadd.f32 %v2471_v28, %v930_v30  ;;  %v2589_v33 = vpop.f32.mrb[1].mxu0  ;;  %v2597_v34 = vpop.f32.mrb[1].mxu1 }
 0x255   : > { %v870_v35 = vpop.f32.mrb[2].mxu0  ;;  %v933_v36 = vpop.f32.mrb[2].mxu1 }
 0x256   : > { %v936_v37 = vpack.c.bf16 %v868_v31, %v868_v31  ;;  %v3184_v38 = vpack.c.bf16 %v931_v32, %v931_v32  ;;  %v2590_v39 = vpop.f32.mrb[3].mxu0  ;;  %v2598_v40 = vpop.f32.mrb[3].mxu1 }
 0x258   : > { %946 = vrot.lane.b32.xlu1 %v3184_v38, %s3576_s5  ;;  %938 = vrot.lane.b32.xlu0 %v936_v37, %s3576_s5  ;;  %v957_v41 = vsel %vm952_vm4, %v3184_v38, 0  ;;  %s3608_s5 = sld [smem:[#allocation17_spill]] }
 0x259   : > { %2600 = vmatpush3.bf16.xpose.msra.mxu0 %v957_v41 }
 0x25a   : > { %2611 = vmatprep.subr.bf16.mxu0 %v2937_v9 }
 0x25c   : > { %948 = vrot.lane.b32.xlu1 %v3184_v38, %s3578_s29 }
 0x260   : > { %950 = vrot.lane.b32.xlu1 %v3184_v38, %s3574_s6  ;;  %2602 = vmatmul.mubr.msk.bf16.vlgmr.msra.gmra.mrb[4].mxu0 %vm952_vm4, %v936_v37 }
 0x261   : > { %2613 = vmatprep.mubr.msk.bf16.mxu0 %vm2938_vm1, %v2937_v9 }
 0x264   : > { %940 = vrot.lane.b32.xlu1 %v936_v37, %s3578_s29  ;;  %s3621_s29 = sld [smem:[#allocation20_spill]] }
 0x268   : > { %942 = vrot.lane.b32.xlu1 %v936_v37, %s3574_s6 }
 0x2ca   : > { %v947_v42 = vpop.permute.xlu1 %946  ;;  %v939_v46 = vpop.permute.xlu0 %938 }
 0x2cb   : > { %v1003_v43 = vsel %vm952_vm4, %v947_v42, 0 }
 0x2cc   : > { %2606 = vmatpush3.bf16.xpose.msra.mxu1 %v1003_v43 }
 0x2cd   : > { %2617 = vmatprep.subr.bf16.mxu1 %v2937_v9 }
 0x2ce   : > { %v3203_v44 = vpop.permute.xlu1 %948 }
 0x2cf   : > { %v1049_v45 = vsel %vm952_vm4, %v3203_v44, 0 }
 0x2d0   : > { %2612 = vmatpush3.bf16.xpose.msra.mxu0 %v1049_v45 }
 0x2d1   : > { %2623 = vmatprep.subr.bf16.mxu0 %v2937_v9 }
 0x2d2   : > { %v3208_v47 = vpop.permute.xlu1 %950 }
 0x2d3   : > { %v1095_v48 = vsel %vm952_vm4, %v3208_v47, 0  ;;  %2608 = vmatmul.mubr.msk.bf16.vlgmr.msra.gmra.mrb[4].mxu1 %vm952_vm4, %v939_v46 }
 0x2d4   : > { %2618 = vmatpush3.bf16.xpose.msra.mxu1 %v1095_v48  ;;  %2619 = vmatprep.mubr.msk.bf16.mxu1 %vm2938_vm1, %v2937_v9 }
 0x2d5   : > { %2629 = vmatprep.subr.bf16.mxu1 %v2937_v9 }
 0x2d6   : > { %v941_v49 = vpop.permute.xlu1 %940 }
 0x2d7   : > { %2614 = vmatmul.mubr.msk.bf16.vlgmr.msra.gmra.mrb[8].mxu0 %vm952_vm4, %v941_v49 }
 0x2d8   : > { %2625 = vmatprep.mubr.msk.bf16.mxu0 %vm2938_vm1, %v2937_v9 }
 0x2da   : > { %v943_v50 = vpop.permute.xlu1 %942 }
 0x2db   : > { %2620 = vmatmul.mubr.msk.bf16.vlgmr.msra.gmra.mrb[8].mxu1 %vm952_vm4, %v943_v50 }
 0x2dc   : > { %2631 = vmatprep.mubr.msk.bf16.mxu1 %vm2938_vm1, %v2937_v9 }
 0x333   : > { %v993_v54 = vpop.f32.mrb[4].mxu0 }
 0x334   : > { %v1137_v55 = vmul.f32 0.35355338, %v993_v54  ;;  %v2603_v56 = vpop.f32.mrb[5].mxu0 }
 0x335   : > { %v996_v57 = vpop.f32.mrb[6].mxu0 }
 0x336   : > { %v2604_v58 = vpop.f32.mrb[7].mxu0  ;;  %v1143_v59 = vsel %vm764_vm5, %v1137_v55, -1e+09 }
 0x337   : > { %v1147_v60 = vsel %vm952_vm4, %v1143_v59, -inf }
 0x338   : > { %1148 = vmax.xlane.f32.xlu1 %v1147_v60 }
 0x3a6   : > { %v1039_v61 = vpop.f32.mrb[4].mxu1 }
 0x3a7   : > { %v1138_v62 = vmul.f32 0.35355338, %v1039_v61  ;;  %v2609_v63 = vpop.f32.mrb[5].mxu1 }
 0x3a8   : > { %v1042_v1 = vpop.f32.mrb[6].mxu1 }
 0x3a9   : > { %v2610_v2 = vpop.f32.mrb[7].mxu1  ;;  %v1144_v3 = vsel %vm764_vm5, %v1138_v62, -1e+09 }
 0x3aa   : > { %v1085_v4 = vpop.f32.mrb[8].mxu0  ;;  %v1150_v5 = vsel %vm952_vm4, %v1144_v3, -inf }
 0x3ab   : > { %v1139_v6 = vmul.f32 0.35355338, %v1085_v4  ;;  %1151 = vmax.xlane.f32.xlu0 %v1150_v5  ;;  %v2615_v7 = vpop.f32.mrb[9].mxu0 }
 0x3ac   : > { %v1088_v8 = vpop.f32.mrb[10].mxu0  ;;  %v2801_v7 = vld [vmem:[%s3549_s13 + $0x8] sm:$0xff]  }
 0x3ad   : > { %v2616_v10 = vpop.f32.mrb[11].mxu0  ;;  %v1145_v11 = vsel %vm764_vm5, %v1139_v6, -1e+09  ;;  %v2800_v6 = vld [vmem:[%s3549_s13] sm:$0xff]  }
 0x3ae   : > { %v1131_v12 = vpop.f32.mrb[8].mxu1  ;;  %v1153_v13 = vsel %vm952_vm4, %v1145_v11, -inf }
 0x3af   : > { %v1140_v14 = vmul.f32 0.35355338, %v1131_v12  ;;  %v2621_v15 = vpop.f32.mrb[9].mxu1  ;;  %1154 = vmax.xlane.f32.xlu1 %v1153_v13 }
 0x3b0   : > { %v1134_v16 = vpop.f32.mrb[10].mxu1 }
 0x3b1   : > { %v2622_v17 = vpop.f32.mrb[11].mxu1  ;;  %v1146_v18 = vsel %vm764_vm5, %v1140_v14, -1e+09 }
 0x3b2   : > { %v1156_v19 = vsel %vm952_vm4, %v1146_v18, -inf }
 0x3b3   : > { %1157 = vmax.xlane.f32.xlu1 %v1156_v19 }
 0x3c1   : > { %1195 = vrot.lane.b32.xlu0 %v3184_v38, %s3572_s9 }
 0x3c4   : > { %1244 = vrot.lane.b32.xlu1 %v947_v42, %s3572_s9 }
 0x3c5   : > { %v1149_v20 = vpop.xlane.xlu1 %1148 }
 0x3c6   : > { %v1159_v21 = vsub.f32 %v1143_v59, %v1149_v20 }
 0x3c8   : > { %v1163_v22 = vmul.f32 1.442695, %v1159_v21 }
 0x3ca   : > { %2818 = vpow2.f32 %v1163_v22 }
 0x3d4   : > { %v2819_v23 = vpop.eup %2818 }
 0x3d5   : > { %v1171_v24 = vsel %vm952_vm4, %v2819_v23, 0.0 }
 0x3e0   : > { %1172 = vadd.xlane.f32.xlu0 %v1171_v24 }
 0x438   : > { %v1152_v25 = vpop.xlane.xlu0 %1151 }
 0x439   : > { %v1160_v26 = vsub.f32 %v1144_v3, %v1152_v25 }
 0x43b   : > { %v1165_v27 = vmul.f32 1.442695, %v1160_v26 }
 0x43c   : > { %v1196_v28 = vpop.permute.xlu0 %1195  ;;  %v1155_v29 = vpop.xlane.xlu1 %1154 }
 0x43d   : > { %2820 = vpow2.f32 %v1165_v27  ;;  %v1202_v30 = vsel %vm1200_vm6, %v1196_v28, 0  ;;  %v1161_v31 = vsub.f32 %v1145_v11, %v1155_v29 }
 0x43e   : > { %2624 = vmatpush3.bf16.msra.mxu0 %v1202_v30 }
 0x43f   : > { %v1167_v32 = vmul.f32 1.442695, %v1161_v31  ;;  %2635 = vmatprep.subr.bf16.mxu0 %v2937_v9  ;;  %v2483_v31 = vld [vmem:[%s3550_s14] ss:$0 sm:$0xff] }
 0x440   : > { %v1158_v33 = vpop.xlane.xlu1 %1157 }
 0x441   : > { %2822 = vpow2.f32 %v1167_v32  ;;  %v1162_v34 = vsub.f32 %v1146_v18, %v1158_v33 }
 0x443   : > { %v1169_v35 = vmul.f32 1.442695, %v1162_v34 }
 0x444   : > { %v1245_v36 = vpop.permute.xlu1 %1244 }
 0x445   : > { %2824 = vpow2.f32 %v1169_v35  ;;  %v1250_v37 = vsel %vm1200_vm6, %v1245_v36, 0 }
 0x446   : > { %2630 = vmatpush3.bf16.msra.mxu1 %v1250_v37 }
 0x447   : > { %v2821_v38 = vpop.eup %2820  ;;  %2641 = vmatprep.subr.bf16.mxu1 %v2937_v9 }
 0x448   : > { %v1174_v39 = vsel %vm952_vm4, %v2821_v38, 0.0 }
 0x449   : > { %1175 = vadd.xlane.f32.xlu1 %v1174_v39 }
 0x44b   : > { %v2823_v40 = vpop.eup %2822 }
 0x44c   : > { %v1177_v41 = vsel %vm952_vm4, %v2823_v40, 0.0 }
 0x44d   : > { %1178 = vadd.xlane.f32.xlu0 %v1177_v41 }
 0x44f   : > { %v2825_v42 = vpop.eup %2824 }
 0x450   : > { %v1180_v43 = vsel %vm952_vm4, %v2825_v42, 0.0 }
 0x451   : > { %1181 = vadd.xlane.f32.xlu1 %v1180_v43 }
 0x462   : > { %1292 = vrot.lane.b32.xlu1 %v3203_v44, %s3572_s9 }
 0x463   : > { %1340 = vrot.lane.b32.xlu0 %v3208_v47, %s3572_s9  ;;  %s3609_s9 = sld [smem:[#allocation18_spill]] }
 0x46d   : > { %v1173_v45 = vpop.xlane.xlu0 %1172 }
 0x46e   : > { %2826 = vrcp.f32 %v1173_v45 }
 0x478   : > { %v2827_v46 = vpop.eup %2826 }
 0x479   : > { %v1187_v48 = vmul.f32 %v2827_v46, %v2819_v23  ;;  %v2803_v46 = vld [vmem:[%s3553_s17 + $0x8] sm:$0xff]  }
 0x47b   : > { %v1191_v49 = vpack.c.bf16 %v1187_v48, %v1187_v48  ;;  %v2804_v48 = vld [vmem:[%s3551_s15] sm:$0xff]  }
 0x47d   : > { %2626 = vmatmul.mubr.msk.bf16.vlgmr.msra.gmra.mrb[12].mxu0 %vm952_vm4, %v1191_v49 }
 0x47e   : > { %2637 = vmatprep.mubr.msk.bf16.mxu0 %vm2938_vm1, %v2937_v9 }
 0x4d6   : > { %v1176_v50 = vpop.xlane.xlu1 %1175 }
 0x4d7   : > { %2828 = vrcp.f32 %v1176_v50  ;;  %v2805_v50 = vld [vmem:[%s3551_s15 + $0x8] sm:$0xff]  }
 0x4da   : > { %v1179_v51 = vpop.xlane.xlu0 %1178 }
 0x4db   : > { %2830 = vrcp.f32 %v1179_v51 }
 0x4de   : > { %v1182_v52 = vpop.xlane.xlu1 %1181  ;;  %v1341_v47 = vpop.permute.xlu0 %1340 }
 0x4df   : > { %2832 = vrcp.f32 %v1182_v52  ;;  %v1346_v60 = vsel %vm1200_vm6, %v1341_v47, 0 }
 0x4e1   : > { %v2829_v44 = vpop.eup %2828 }
 0x4e2   : > { %v1188_v54 = vmul.f32 %v2829_v44, %v2821_v38  ;;  %v1293_v55 = vpop.permute.xlu1 %1292 }
 0x4e3   : > { %v1298_v56 = vsel %vm1200_vm6, %v1293_v55, 0 }
 0x4e4   : > { %2636 = vmatpush3.bf16.msra.mxu0 %v1298_v56  ;;  %v1192_v57 = vpack.c.bf16 %v1188_v54, %v1188_v54 }
 0x4e5   : > { %v2831_v58 = vpop.eup %2830  ;;  %2647 = vmatprep.subr.bf16.mxu0 %v2937_v9 }
 0x4e6   : > { %v1189_v59 = vmul.f32 %v2831_v58, %v2823_v40  ;;  %2632 = vmatmul.mubr.msk.bf16.vlgmr.msra.gmra.mrb[12].mxu1 %vm952_vm4, %v1192_v57  ;;  %v2487_v58 = vld [vmem:[%s3608_s5] ss:$0 sm:$0xff]  ;;  %s3615_s5 = smov 96  }
 0x4e7   : > { %2642 = vmatpush3.bf16.msra.mxu1 %v1346_v60  ;;  %2643 = vmatprep.mubr.msk.bf16.mxu1 %vm2938_vm1, %v2937_v9 }
 0x4e8   : > { %v1193_v61 = vpack.c.bf16 %v1189_v59, %v1189_v59  ;;  %2655 = vmatprep.subr.bf16.mxu1 %v2937_v9 }
 0x4e9   : > { %v2833_v62 = vpop.eup %2832 }
 0x4ea   : > { %v1190_v63 = vmul.f32 %v2833_v62, %v2825_v42  ;;  %2638 = vmatmul.mubr.msk.bf16.vlgmr.msra.gmra.mrb[16].mxu0 %vm952_vm4, %v1193_v61  ;;  %v2488_v61 = vld [vmem:[%s3609_s9] ss:$0 sm:$0xff]  ;;  %s3616_s9 = sld [smem:[#allocation23_spill]] }
 0x4eb   : > { %2651 = vmatprep.mubr.msk.bf16.mxu0 %vm2938_vm1, %v2937_v9  ;;  %2648 = vmatpush3.bf16.msra.mxu0 %v2800_v6 }
 0x4ec   : > { %v1194_v1 = vpack.c.bf16 %v1190_v63, %v1190_v63  ;;  %2649 = vmatprep.subr.bf16.mxu0 %v2937_v9 }
 0x4ee   : > { %2644 = vmatmul.mubr.msk.bf16.vlgmr.msra.gmra.mrb[16].mxu1 %vm952_vm4, %v1194_v1 }
 0x4ef   : > { %2659 = vmatprep.mubr.msk.bf16.mxu1 %vm2938_vm1, %v2937_v9  ;;  %2650 = vmatpush3.bf16.msra.mxu0 %v2801_v7 }
 0x4f0   : > { %2663 = vmatprep.subr.bf16.mxu0 %v2937_v9  ;;  %2656 = vmatpush3.bf16.msra.mxu1 %v2804_v48 }
 0x4f1   : > { %2657 = vmatprep.subr.bf16.mxu1 %v2937_v9 }
 0x4f4   : > { %2658 = vmatpush3.bf16.msra.mxu1 %v2805_v50 }
 0x4f5   : > { %2671 = vmatprep.subr.bf16.mxu1 %v2937_v9 }
 0x550   : > { %v1238_v2 = vpop.f32.mrb[12].mxu0 }
 0x551   : > { %v2627_v3 = vpop.f32.mrb[13].mxu0  ;;  %v1388_v25 = vpack.c.bf16 %v1238_v2, %v1238_v2  ;;  %v2493_v2 = vld [vmem:[%s3554_s18] ss:$0 sm:$0xff] }
 0x552   : > { %v1241_v4 = vpop.f32.mrb[14].mxu0 }
 0x553   : > { %v2628_v5 = vpop.f32.mrb[15].mxu0 }
 0x5b9   : > { %v1286_v8 = vpop.f32.mrb[12].mxu1 }
 0x5ba   : > { %v1389_v10 = vpack.c.bf16 %v1286_v8, %v1286_v8  ;;  %v2633_v11 = vpop.f32.mrb[13].mxu1 }
 0x5bb   : > { %v1289_v12 = vpop.f32.mrb[14].mxu1 }
 0x5bc   : > { %1393 = vrot.lane.b32.xlu1 %v1389_v10, %s3571_s1  ;;  %v2634_v13 = vpop.f32.mrb[15].mxu1 }
 0x5bd   : > { %v1334_v14 = vpop.f32.mrb[16].mxu0  ;;  %v2489_v13 = vld [vmem:[%s3552_s16] ss:$0 sm:$0xff] }
 0x5be   : > { %v1390_v15 = vpack.c.bf16 %v1334_v14, %v1334_v14  ;;  %v2639_v16 = vpop.f32.mrb[17].mxu0 }
 0x5bf   : > { %v1337_v17 = vpop.f32.mrb[18].mxu0 }
 0x5c0   : > { %1396 = vrot.lane.b32.xlu0 %v1390_v15, %s3570_s30  ;;  %v2640_v18 = vpop.f32.mrb[19].mxu0  ;;  %s3607_s30 = sld [smem:[#allocation14_spill]] }
 0x5c1   : > { %v1382_v19 = vpop.f32.mrb[16].mxu1 }
 0x5c2   : > { %v1391_v20 = vpack.c.bf16 %v1382_v19, %v1382_v19  ;;  %v2645_v21 = vpop.f32.mrb[17].mxu1 }
 0x5c3   : > { %v1385_v22 = vpop.f32.mrb[18].mxu1 }
 0x5c4   : > { %1399 = vrot.lane.b32.xlu1 %v1391_v20, %s3569_s7  ;;  %v2646_v23 = vpop.f32.mrb[19].mxu1 }
 0x5c6   : > { %s756_s1 = scalar_lea.vmem %s3607_s30, %s3606_s27  ;;  %s3610_s27 = smov 112  }
 0x5c7   : > { %v759_v45 = vld [vmem:[%s756_s1] sm:$0xff]  ;;  %s746_s30 = sand.u32 1, %s2926_s26  }
 0x5c8   : > { %v1579_v49 = vpack.c.bf16 %v759_v45, %v759_v45 }
 0x62e   : > { %v1394_v24 = vpop.permute.xlu1 %1393 }
 0x62f   : > { %v1403_v27 = vsel %vm952_vm4, %v1388_v25, %v1394_v24 }
 0x632   : > { %v1397_v26 = vpop.permute.xlu0 %1396 }
 0x633   : > { %v1406_v28 = vsel %vm1404_vm7, %v1403_v27, %v1397_v26  ;;  %v766_v27 = vstv %s765_s4 }
 0x634   : > { %vm3377_vm11 = vcmp.lt.s32.totalorder %v3222_v53, %v766_v27 }
 0x636   : > { %v1400_v29 = vpop.permute.xlu1 %1399 }
 0x637   : > { %v1409_v30 = vsel %vm1407_vm8, %v1406_v28, %v1400_v29 }
 0x638   : > { %2652 = vmatmul.mubr.msk.bf16.vlgmr.msra.gmra.mrb[20].mxu0 %vm770_vm0, %v1409_v30 }
 0x639   : > { %2667 = vmatprep.mubr.msk.bf16.mxu0 %vm2938_vm1, %v2937_v9 }
 0x70b   : > { %v1469_v32 = vpop.f32.mrb[20].mxu0 }
 0x70c   : > { %v1470_v33 = vadd.f32 %v2483_v31, %v1469_v32  ;;  %v2653_v34 = vpop.f32.mrb[21].mxu0 }
 0x70d   : > { %v1472_v35 = vpop.f32.mrb[22].mxu0 }
 0x70e   : > { %v3289_v36 = vadd.f32 %v1470_v33, %v3138_v0  ;;  %v2654_v37 = vpop.f32.mrb[23].mxu0  ;;  %v2802_v0 = vld [vmem:[%s3553_s17] sm:$0xff]  }
 0x70f   : > { %2664 = vmatpush3.bf16.msra.mxu0 %v2802_v0 }
 0x710   : > { %v1478_v38 = vsel %vm770_vm0, %v3289_v36, 0.0  ;;  %2665 = vmatprep.subr.bf16.mxu0 %v2937_v9 }
 0x711   : > { %1479 = vadd.xlane.f32.xlu0 %v1478_v38 }
 0x713   : > { %2666 = vmatpush3.bf16.msra.mxu0 %v2803_v46 }
 0x714   : > { %2677 = vmatprep.subr.bf16.mxu0 %v2937_v9 }
 0x716   : > { %2668 = vmatmul.mubr.msk.bf16.vlgmr.msra.gmra.mrb[24].mxu0 %vm770_vm0, %v1579_v49 }
 0x717   : > { %2679 = vmatprep.mubr.msk.bf16.mxu0 %vm2938_vm1, %v2937_v9 }
 0x79e   : > { %v1480_v39 = vpop.xlane.xlu0 %1479 }
 0x79f   : > { %v1481_v40 = vmul.f32 0.03125, %v1480_v39 }
 0x7a1   : > { %v1482_v41 = vsub.f32 %v3289_v36, %v1481_v40 }
 0x7a3   : > { %v1483_v42 = vmul.f32 %v1482_v41, %v1482_v41  ;;  %v1503_v59 = vmul.f32 %v2487_v58, %v1482_v41 }
 0x7a5   : > { %v1484_v43 = vsel %vm770_vm0, %v1483_v42, 0.0 }
 0x7a6   : > { %1485 = vadd.xlane.f32.xlu1 %v1484_v43 }
 0x7e9   : > { %v1640_v3 = vpop.f32.mrb[24].mxu0 }
 0x7ea   : > { %v1641_v4 = vadd.f32 %v2493_v2, %v1640_v3  ;;  %v2669_v5 = vpop.f32.mrb[25].mxu0 }
 0x7eb   : > { %v1643_v6 = vpop.f32.mrb[26].mxu0 }
 0x7ec   : > { %v3331_v7 = vpack.c.bf16 %v1641_v4, %v1641_v4  ;;  %v2670_v8 = vpop.f32.mrb[27].mxu0 }
 0x7ee   : > { %1658 = vrot.lane.b32.xlu1 %v3331_v7, %s3610_s27  ;;  %1656 = vrot.lane.b32.xlu0 %v3331_v7, %s3611_s28  ;;  %v1666_v10 = vsel %vm952_vm4, %v3331_v7, 0 }
 0x7f2   : > { %1660 = vrot.lane.b32.xlu1 %v3331_v7, %s3612_s2 }
 0x833   : > { %v1486_v51 = vpop.xlane.xlu1 %1485 }
 0x834   : > { %v1487_v52 = vmul.f32 0.032258064, %v1486_v51 }
 0x836   : > { %2834 = vrsqrt.f32 %v1487_v52  ;;  %vm1490_vm9 = vcmp.eq.f32.partialorder %v1487_v52, inf  ;;  %v1493_v55 = vand.u32 2147483648, %v1487_v52  ;;  %vm1492_vm10 = vcmp.eq.f32.partialorder %v1487_v52, 0.0 }
 0x840   : > { %v2835_v44 = vpop.eup %2834 }
 0x841   : > { %v1489_v54 = vmul.f32 %v2835_v44, %v1487_v52 }
 0x843   : > { %v1491_v47 = vsel %vm1490_vm9, %v1487_v52, %v1489_v54 }
 0x844   : > { %v1494_v56 = vsel %vm1492_vm10, %v1493_v55, %v1491_v47 }
 0x845   : > { %v1495_v57 = vadd.f32 1e-06, %v1494_v56 }
 0x847   : > { %2836 = vrcp.f32 %v1495_v57 }
 0x851   : > { %v2837_v60 = vpop.eup %2836 }
 0x852   : > { %v1504_v62 = vmul.f32 %v2837_v60, %v1503_v59 }
 0x854   : > { %v1511_v63 = vadd.f32 %v2488_v61, %v1504_v62 }
 0x856   : > { %v1512_v1 = vpack.c.bf16 %v1511_v63, %v1511_v63 }
 0x858   : > { %2660 = vmatmul.mubr.msk.bf16.vlgmr.msra.gmra.mrb[20].mxu1 %vm770_vm0, %v1512_v1 }
 0x859   : > { %2673 = vmatprep.mubr.msk.bf16.mxu1 %vm2938_vm1, %v2937_v9  ;;  %2672 = vmatpush3.bf16.xpose.msra.mxu1 %v1666_v10 }
 0x85a   : > { %2683 = vmatprep.subr.bf16.mxu1 %v2937_v9 }
 0x860   : > { %v3342_v11 = vpop.permute.xlu0 %1656  ;;  %v3350_v20 = vpop.permute.xlu1 %1658 }
 0x861   : > { %v1712_v12 = vsel %vm952_vm4, %v3342_v11, 0  ;;  %v1758_v21 = vsel %vm952_vm4, %v3350_v20, 0 }
 0x862   : > { %2678 = vmatpush3.bf16.xpose.msra.mxu0 %v1712_v12 }
 0x863   : > { %2689 = vmatprep.subr.bf16.mxu0 %v2937_v9 }
 0x864   : > { %v3361_v22 = vpop.permute.xlu1 %1660 }
 0x865   : > { %v1804_v24 = vsel %vm952_vm4, %v3361_v22, 0 }
 0x92b   : > { %v1573_v14 = vpop.f32.mrb[20].mxu1 }
 0x92c   : > { %v1574_v15 = vadd.f32 %v2489_v13, %v1573_v14  ;;  %v2661_v16 = vpop.f32.mrb[21].mxu1 }
 0x92d   : > { %v1576_v17 = vpop.f32.mrb[22].mxu1 }
 0x92e   : > { %v1646_v18 = vpack.c.bf16 %v1574_v15, %v1574_v15  ;;  %v2662_v19 = vpop.f32.mrb[23].mxu1 }
 0x930   : > { %1652 = vrot.lane.b32.xlu1 %v1646_v18, %s3612_s2  ;;  %1648 = vrot.lane.b32.xlu0 %v1646_v18, %s3611_s28  ;;  %s3618_s28 = smov 16   ;;  %s3619_s2 = smov 24  }
 0x931   : > { %2674 = vmatmul.mubr.msk.bf16.vlgmr.msra.gmra.mrb[24].mxu1 %vm952_vm4, %v1646_v18 }
 0x932   : > { %2684 = vmatpush3.bf16.xpose.msra.mxu1 %v1758_v21  ;;  %2685 = vmatprep.mubr.msk.bf16.mxu1 %vm2938_vm1, %v2937_v9 }
 0x933   : > { %2695 = vmatprep.subr.bf16.mxu1 %v2937_v9 }
 0x934   : > { %1650 = vrot.lane.b32.xlu0 %v1646_v18, %s3610_s27  ;;  %s3617_s27 = smov 8  }
 0x9a2   : > { %v1649_v23 = vpop.permute.xlu0 %1648  ;;  %v1653_v26 = vpop.permute.xlu1 %1652 }
 0x9a3   : > { %2680 = vmatmul.mubr.msk.bf16.vlgmr.msra.gmra.mrb[28].mxu0 %vm952_vm4, %v1649_v23 }
 0x9a4   : > { %2690 = vmatpush3.bf16.xpose.msra.mxu0 %v1804_v24  ;;  %2691 = vmatprep.mubr.msk.bf16.mxu0 %vm2938_vm1, %v2937_v9 }
 0x9a5   : > { %2701 = vmatprep.subr.bf16.mxu0 %v2937_v9 }
 0x9a6   : > { %v1651_v25 = vpop.permute.xlu0 %1650 }
 0x9a7   : > { %2686 = vmatmul.mubr.msk.bf16.vlgmr.msra.gmra.mrb[28].mxu1 %vm952_vm4, %v1651_v25 }
 0x9a8   : > { %2697 = vmatprep.mubr.msk.bf16.mxu1 %vm2938_vm1, %v2937_v9 }
 0x9ab   : > { %2692 = vmatmul.mubr.msk.bf16.vlgmr.msra.gmra.mrb[32].mxu0 %vm952_vm4, %v1653_v26 }
 0x9ac   : > { %2703 = vmatprep.mubr.msk.bf16.mxu0 %vm2938_vm1, %v2937_v9 }
 0xa04   : > { %v1702_v28 = vpop.f32.mrb[24].mxu1 }
 0xa05   : > { %v1846_v30 = vmul.f32 0.35355338, %v1702_v28  ;;  %v2675_v31 = vpop.f32.mrb[25].mxu1 }
 0xa06   : > { %v1705_v32 = vpop.f32.mrb[26].mxu1 }
 0xa07   : > { %v2676_v33 = vpop.f32.mrb[27].mxu1  ;;  %v1852_v34 = vsel %vm3377_vm11, %v1846_v30, -1e+09 }
 0xa08   : > { %v1856_v35 = vsel %vm952_vm4, %v1852_v34, -inf }
 0xa09   : > { %1857 = vmax.xlane.f32.xlu0 %v1856_v35 }
 0xa76   : > { %v1748_v37 = vpop.f32.mrb[28].mxu0 }
 0xa77   : > { %v1847_v38 = vmul.f32 0.35355338, %v1748_v37  ;;  %v2681_v39 = vpop.f32.mrb[29].mxu0 }
 0xa78   : > { %v1751_v40 = vpop.f32.mrb[30].mxu0 }
 0xa79   : > { %v2682_v41 = vpop.f32.mrb[31].mxu0  ;;  %v1853_v53 = vsel %vm3377_vm11, %v1847_v38, -1e+09 }
 0xa7a   : > { %v1794_v42 = vpop.f32.mrb[28].mxu1  ;;  %v1859_v43 = vsel %vm952_vm4, %v1853_v53, -inf }
 0xa7b   : > { %v1848_v0 = vmul.f32 0.35355338, %v1794_v42  ;;  %v2687_v45 = vpop.f32.mrb[29].mxu1  ;;  %1860 = vmax.xlane.f32.xlu1 %v1859_v43  ;;  %v2806_v43 = vld [vmem:[%s3616_s9] sm:$0xff]  }
 0xa7c   : > { %v1797_v46 = vpop.f32.mrb[30].mxu1 }
 0xa7d   : > { %v2688_v48 = vpop.f32.mrb[31].mxu1  ;;  %v1854_v49 = vsel %vm3377_vm11, %v1848_v0, -1e+09  ;;  %v2807_v0 = vld [vmem:[%s3616_s9 + $0x8] sm:$0xff]  }
 0xa7e   : > { %v1840_v50 = vpop.f32.mrb[32].mxu0  ;;  %v1862_v51 = vsel %vm952_vm4, %v1854_v49, -inf }
 0xa7f   : > { %v1849_v52 = vmul.f32 0.35355338, %v1840_v50  ;;  %1863 = vmax.xlane.f32.xlu0 %v1862_v51  ;;  %v2693_v44 = vpop.f32.mrb[33].mxu0 }
 0xa80   : > { %v1843_v54 = vpop.f32.mrb[34].mxu0 }
 0xa81   : > { %v2694_v55 = vpop.f32.mrb[35].mxu0  ;;  %v1855_v47 = vsel %vm3377_vm11, %v1849_v52, -1e+09 }
 0xa82   : > { %v1865_v56 = vsel %vm952_vm4, %v1855_v47, -inf }
 0xa83   : > { %1866 = vmax.xlane.f32.xlu0 %v1865_v56 }
 0xa8c   : > { %1904 = vrot.lane.b32.xlu1 %v3331_v7, %s3615_s5 }
 0xa96   : > { %v1858_v57 = vpop.xlane.xlu0 %1857 }
 0xa97   : > { %v1868_v58 = vsub.f32 %v1852_v34, %v1858_v57 }
 0xa99   : > { %v1872_v59 = vmul.f32 1.442695, %v1868_v58 }
 0xa9b   : > { %2838 = vpow2.f32 %v1872_v59 }
 0xaa5   : > { %v2839_v60 = vpop.eup %2838 }
 0xaa6   : > { %v1880_v61 = vsel %vm952_vm4, %v2839_v60, 0.0 }
 0xab0   : > { %1881 = vadd.xlane.f32.xlu1 %v1880_v61 }
 0xb08   : > { %v1861_v62 = vpop.xlane.xlu1 %1860 }
 0xb09   : > { %v1869_v63 = vsub.f32 %v1853_v53, %v1861_v62 }
 0xb0b   : > { %v1874_v1 = vmul.f32 1.442695, %v1869_v63 }
 0xb0c   : > { %v1864_v2 = vpop.xlane.xlu0 %1863  ;;  %v1905_v3 = vpop.permute.xlu1 %1904 }
 0xb0d   : > { %2840 = vpow2.f32 %v1874_v1  ;;  %v1870_v4 = vsub.f32 %v1854_v49, %v1864_v2  ;;  %v1910_v5 = vsel %vm1200_vm6, %v1905_v3, 0 }
 0xb0e   : > { %2696 = vmatpush3.bf16.msra.mxu1 %v1910_v5 }
 0xb0f   : > { %v1876_v6 = vmul.f32 1.442695, %v1870_v4  ;;  %2707 = vmatprep.subr.bf16.mxu1 %v2937_v9  ;;  %v2505_v4 = vld [vmem:[%s3556_s20] ss:$0 sm:$0xff] }
 0xb10   : > { %v1867_v7 = vpop.xlane.xlu0 %1866 }
 0xb11   : > { %2842 = vpow2.f32 %v1876_v6  ;;  %v1871_v8 = vsub.f32 %v1855_v47, %v1867_v7 }
 0xb13   : > { %v1878_v10 = vmul.f32 1.442695, %v1871_v8 }
 0xb15   : > { %2844 = vpow2.f32 %v1878_v10 }
 0xb17   : > { %v2841_v12 = vpop.eup %2840 }
 0xb18   : > { %v1883_v13 = vsel %vm952_vm4, %v2841_v12, 0.0 }
 0xb19   : > { %1884 = vadd.xlane.f32.xlu0 %v1883_v13 }
 0xb1b   : > { %v2843_v14 = vpop.eup %2842 }
 0xb1c   : > { %v1886_v15 = vsel %vm952_vm4, %v2843_v14, 0.0 }
 0xb1d   : > { %1887 = vadd.xlane.f32.xlu1 %v1886_v15 }
 0xb1f   : > { %v2845_v16 = vpop.eup %2844 }
 0xb20   : > { %v1889_v17 = vsel %vm952_vm4, %v2845_v16, 0.0 }
 0xb21   : > { %1890 = vadd.xlane.f32.xlu0 %v1889_v17 }
 0xb2e   : > { %2000 = vrot.lane.b32.xlu1 %v3350_v20, %s3615_s5 }
 0xb32   : > { %2048 = vrot.lane.b32.xlu1 %v3361_v22, %s3615_s5 }
 0xb37   : > { %1952 = vrot.lane.b32.xlu0 %v3342_v11, %s3615_s5 }
 0xb3d   : > { %v1882_v18 = vpop.xlane.xlu1 %1881 }
 0xb3e   : > { %2846 = vrcp.f32 %v1882_v18 }
 0xb48   : > { %v2847_v19 = vpop.eup %2846 }
 0xb49   : > { %v1896_v21 = vmul.f32 %v2847_v19, %v2839_v60  ;;  %v2808_v19 = vld [vmem:[%s3557_s21] sm:$0xff]  }
 0xb4b   : > { %v1900_v23 = vpack.c.bf16 %v1896_v21, %v1896_v21  ;;  %v2810_v21 = vld [vmem:[%s3559_s23] sm:$0xff]  }
 0xb4d   : > { %2698 = vmatmul.mubr.msk.bf16.vlgmr.msra.gmra.mrb[32].mxu1 %vm952_vm4, %v1900_v23  ;;  %v2811_v23 = vld [vmem:[%s3559_s23 + $0x8] sm:$0xff]  }
 0xb4e   : > { %2709 = vmatprep.mubr.msk.bf16.mxu1 %vm2938_vm1, %v2937_v9 }
 0xba6   : > { %v1885_v24 = vpop.xlane.xlu0 %1884 }
 0xba7   : > { %2848 = vrcp.f32 %v1885_v24 }
 0xbaa   : > { %v1888_v25 = vpop.xlane.xlu1 %1887 }
 0xbab   : > { %2850 = vrcp.f32 %v1888_v25 }
 0xbae   : > { %v2001_v20 = vpop.permute.xlu1 %2000  ;;  %v1891_v26 = vpop.xlane.xlu0 %1890 }
 0xbaf   : > { %v2006_v22 = vsel %vm1200_vm6, %v2001_v20, 0  ;;  %2852 = vrcp.f32 %v1891_v26 }
 0xbb0   : > { %2708 = vmatpush3.bf16.msra.mxu1 %v2006_v22 }
 0xbb1   : > { %v2849_v11 = vpop.eup %2848  ;;  %2719 = vmatprep.subr.bf16.mxu1 %v2937_v9 }
 0xbb2   : > { %v1897_v27 = vmul.f32 %v2849_v11, %v2841_v12  ;;  %v1953_v28 = vpop.permute.xlu0 %1952  ;;  %v2049_v30 = vpop.permute.xlu1 %2048 }
 0xbb3   : > { %v1958_v29 = vsel %vm1200_vm6, %v1953_v28, 0  ;;  %v2054_v34 = vsel %vm1200_vm6, %v2049_v30, 0 }
 0xbb4   : > { %2702 = vmatpush3.bf16.msra.mxu0 %v1958_v29  ;;  %v1901_v31 = vpack.c.bf16 %v1897_v27, %v1897_v27  ;;  %v2509_v29 = vld [vmem:[%s3620_s10] ss:$0 sm:$0xff]  ;;  %s2462_s10 = sshll.u32 %s746_s30, 3 }
 0xbb5   : > { %v2851_v32 = vpop.eup %2850  ;;  %2713 = vmatprep.subr.bf16.mxu0 %v2937_v9  ;;  %s748_s6 = scalar_lea.vmem [#allocation4], %s2462_s10  ;;  %s2946_s10 = smov [#allocation4]  }
 0xbb6   : > { %v1898_v33 = vmul.f32 %v2851_v32, %v2843_v14  ;;  %v2510_v32 = vld [vmem:[%s3621_s29] ss:$0 sm:$0xff]  ;;  %s2522_s29 = sshll.u32 %s3101_s19, 7  ;;  %s2387_s1 = sshll.u32 %s748_s6, 4  ;;  %s3495_s1 = int_to_ptr.vmem [resolvable:$true] %s2387_s1 }
 0xbb7   : > { %2704 = vmatmul.mubr.msk.bf16.vlgmr.msra.gmra.mrb[36].mxu0 %vm952_vm4, %v1901_v31  ;;  %s2374_s19 = scalar_lea.sflag [#allocation5], %s746_s30  ;;  %s2874_s4 = sshll.u32 %s2946_s10, 4  ;;  %s2875_s4 = int_to_ptr.vmem [resolvable:$false] %s2874_s4 }
 0xbb8   : > { %2714 = vmatpush3.bf16.msra.mxu0 %v2054_v34  ;;  %v1902_v35 = vpack.c.bf16 %v1898_v33, %v1898_v33  ;;  %2715 = vmatprep.mubr.msk.bf16.mxu0 %vm2938_vm1, %v2937_v9  ;;  %s2876_s5 = scalar_lea.vmem %s2875_s4, 256  ;;  %p2877_p5 = scmp.lt.s32.totalorder %s3495_s1, %s2875_s4 }
 0xbb9   : > { %v2853_v37 = vpop.eup %2852  ;;  %2727 = vmatprep.subr.bf16.mxu0 %v2937_v9 }
 0xbba   : > { %v1899_v38 = vmul.f32 %v2853_v37, %v2845_v16  ;;  %2710 = vmatmul.mubr.msk.bf16.vlgmr.msra.gmra.mrb[36].mxu1 %vm952_vm4, %v1902_v35  ;;  %v2812_v37 = vld [vmem:[%s3559_s23 + $0x10] sm:$0xff]  }
 0xbbb   : > { %2723 = vmatprep.mubr.msk.bf16.mxu1 %vm2938_vm1, %v2937_v9  ;;  %2720 = vmatpush3.bf16.msra.mxu1 %v2806_v43 }
 0xbbc   : > { %v1903_v39 = vpack.c.bf16 %v1899_v38, %v1899_v38  ;;  %2721 = vmatprep.subr.bf16.mxu1 %v2937_v9  ;;  %v2813_v38 = vld [vmem:[%s3559_s23 + $0x18] sm:$0xff]  }
 0xbbf   : > { %2716 = vmatmul.mubr.msk.bf16.vlgmr.msra.gmra.mrb[40].mxu0 %vm952_vm4, %v1903_v39  ;;  %2722 = vmatpush3.bf16.msra.mxu1 %v2807_v0  ;;  %v2511_v39 = vld [vmem:[%s3558_s22] ss:$0 sm:$0xff] }
 0xbc0   : > { %2731 = vmatprep.mubr.msk.bf16.mxu0 %vm2938_vm1, %v2937_v9  ;;  %2735 = vmatprep.subr.bf16.mxu1 %v2937_v9 }
 0xbc1   : > { %2728 = vmatpush3.bf16.msra.mxu0 %v2808_v19 }
 0xbc2   : > { %2729 = vmatprep.subr.bf16.mxu0 %v2937_v9 }
 0xc20   : > { %v1946_v40 = vpop.f32.mrb[32].mxu1 }
 0xc21   : > { %v2699_v41 = vpop.f32.mrb[33].mxu1  ;;  %v2096_v61 = vpack.c.bf16 %v1946_v40, %v1946_v40 }
 0xc22   : > { %v1949_v53 = vpop.f32.mrb[34].mxu1 }
 0xc23   : > { %v2700_v42 = vpop.f32.mrb[35].mxu1 }
 0xc8a   : > { %v1994_v45 = vpop.f32.mrb[36].mxu0 }
 0xc8b   : > { %v2097_v46 = vpack.c.bf16 %v1994_v45, %v1994_v45  ;;  %v2705_v48 = vpop.f32.mrb[37].mxu0 }
 0xc8c   : > { %v1997_v49 = vpop.f32.mrb[38].mxu0 }
 0xc8d   : > { %v2042_v50 = vpop.f32.mrb[36].mxu1  ;;  %2101 = vrot.lane.b32.xlu0 %v2097_v46, %s3617_s27  ;;  %v2706_v51 = vpop.f32.mrb[39].mxu0  ;;  %v2520_v46 = vld [vmem:[%s3560_s24] ss:$0 sm:$0xff] }
 0xc8e   : > { %v2098_v52 = vpack.c.bf16 %v2042_v50, %v2042_v50  ;;  %v2711_v44 = vpop.f32.mrb[37].mxu1 }
 0xc8f   : > { %v2045_v54 = vpop.f32.mrb[38].mxu1 }
 0xc90   : > { %2104 = vrot.lane.b32.xlu1 %v2098_v52, %s3618_s28  ;;  %v2712_v55 = vpop.f32.mrb[39].mxu1  ;;  %s3493_s28 = scalar_lea.hbm %s3561_s25, %s2522_s29 }
 0xc92   : > { %v2090_v47 = vpop.f32.mrb[40].mxu0 }
 0xc93   : > { %v2099_v56 = vpack.c.bf16 %v2090_v47, %v2090_v47  ;;  %v2717_v57 = vpop.f32.mrb[41].mxu0 }
 0xc94   : > { %v2093_v58 = vpop.f32.mrb[42].mxu0 }
 0xc95   : > { %2107 = vrot.lane.b32.xlu0 %v2099_v56, %s3619_s2  ;;  %v2718_v59 = vpop.f32.mrb[43].mxu0  ;;  %s2870_s2 = scalar_lea.vmem %s3495_s1, 128 }
 0xc96   : > { %p2871_p2 = scmp.ne.s32.totalorder %s3495_s1, %s2870_s2  ;;  %p2878_p6 = scmp.lt.s32.totalorder %s2876_s5, %s2870_s2 }
 0xc98   : > { %p2872_p3 = pnand %p2871_p2, %p3118_p10  ;;  %p2879_p7 = por %p2878_p6, %p2877_p5 }
 0xc9a   : > { %p2873_p4 = pneg %p2872_p3 }
 0xc9c   : > { %p2880_p8 = pnand %p2879_p7, %p2873_p4 }
 0xcff   : > { %v2102_v60 = vpop.permute.xlu0 %2101 }
 0xd00   : > { %v2111_v63 = vsel %vm952_vm4, %v2096_v61, %v2102_v60 }
 0xd02   : > { %v2105_v62 = vpop.permute.xlu1 %2104 }
 0xd03   : > { %v2113_v1 = vsel %vm1404_vm7, %v2111_v63, %v2105_v62 }
 0xd07   : > { %v2108_v2 = vpop.permute.xlu0 %2107 }
 0xd08   : > { %v2115_v3 = vsel %vm1407_vm8, %v2113_v1, %v2108_v2 }
 0xd09   : > { %2724 = vmatmul.mubr.msk.bf16.vlgmr.msra.gmra.mrb[40].mxu1 %vm770_vm0, %v2115_v3 }
 0xd0a   : > { %2743 = vmatprep.mubr.msk.bf16.mxu1 %vm2938_vm1, %v2937_v9  ;;  %2736 = vmatpush3.bf16.msra.mxu1 %v2810_v21 }
 0xd0b   : > { %2737 = vmatprep.subr.bf16.mxu1 %v2937_v9 }
 0xd0e   : > { %2738 = vmatpush3.bf16.msra.mxu1 %v2811_v23 }
 0xd0f   : > { %2739 = vmatprep.subr.bf16.mxu1 %v2937_v9 }
 0xd12   : > { %2740 = vmatpush3.bf16.msra.mxu1 %v2812_v37 }
 0xd13   : > { %2741 = vmatprep.subr.bf16.mxu1 %v2937_v9 }
 0xd16   : > { %2742 = vmatpush3.bf16.msra.mxu1 %v2813_v38 }
 0xddc   : > { %v2175_v5 = vpop.f32.mrb[40].mxu1 }
 0xddd   : > { %v2176_v6 = vadd.f32 %v2505_v4, %v2175_v5  ;;  %v2725_v7 = vpop.f32.mrb[41].mxu1 }
 0xdde   : > { %v2178_v8 = vpop.f32.mrb[42].mxu1 }
 0xddf   : > { %v3446_v10 = vadd.f32 %v2176_v6, %v3289_v36  ;;  %v2726_v12 = vpop.f32.mrb[43].mxu1  ;;  %v2809_v36 = vld [vmem:[%s3557_s21 + $0x8] sm:$0xff]  }
 0xde0   : > { %2730 = vmatpush3.bf16.msra.mxu0 %v2809_v36 }
 0xde1   : > { %v2184_v13 = vsel %vm770_vm0, %v3446_v10, 0.0 }
 0xde2   : > { %2185 = vadd.xlane.f32.xlu1 %v2184_v13 }
 0xe6f   : > { %v2186_v14 = vpop.xlane.xlu1 %2185 }
 0xe70   : > { %v2187_v15 = vmul.f32 0.03125, %v2186_v14 }
 0xe72   : > { %v2188_v16 = vsub.f32 %v3446_v10, %v2187_v15 }
 0xe74   : > { %v2189_v17 = vmul.f32 %v2188_v16, %v2188_v16  ;;  %v2209_v30 = vmul.f32 %v2509_v29, %v2188_v16 }
 0xe76   : > { %v2190_v18 = vsel %vm770_vm0, %v2189_v17, 0.0 }
 0xe77   : > { %2191 = vadd.xlane.f32.xlu0 %v2190_v18 }
 0xf04   : > { %v2192_v24 = vpop.xlane.xlu0 %2191 }
 0xf05   : > { %v2193_v25 = vmul.f32 0.032258064, %v2192_v24 }
 0xf07   : > { %2854 = vrsqrt.f32 %v2193_v25  ;;  %vm2196_vm12 = vcmp.eq.f32.partialorder %v2193_v25, inf  ;;  %v2199_v22 = vand.u32 2147483648, %v2193_v25  ;;  %vm2198_vm13 = vcmp.eq.f32.partialorder %v2193_v25, 0.0 }
 0xf11   : > { %v2855_v20 = vpop.eup %2854 }
 0xf12   : > { %v2195_v26 = vmul.f32 %v2855_v20, %v2193_v25 }
 0xf14   : > { %v2197_v11 = vsel %vm2196_vm12, %v2193_v25, %v2195_v26 }
 0xf15   : > { %v2200_v27 = vsel %vm2198_vm13, %v2199_v22, %v2197_v11 }
 0xf16   : > { %v2201_v28 = vadd.f32 1e-06, %v2200_v27 }
 0xf18   : > { %2856 = vrcp.f32 %v2201_v28 }
 0xf22   : > { %v2857_v31 = vpop.eup %2856 }
 0xf23   : > { %v2210_v33 = vmul.f32 %v2857_v31, %v2209_v30 }
 0xf25   : > { %v2217_v34 = vadd.f32 %v2510_v32, %v2210_v33 }
 0xf27   : > { %v2218_v35 = vpack.c.bf16 %v2217_v34, %v2217_v34 }
 0xf29   : > { %2732 = vmatmul.mubr.msk.bf16.vlgmr.msra.gmra.mrb[44].mxu0 %vm770_vm0, %v2218_v35 }
 0xffc   : > { %v2279_v40 = vpop.f32.mrb[44].mxu0 }
 0xffd   : > { %v2280_v41 = vadd.f32 %v2511_v39, %v2279_v40  ;;  %v2733_v53 = vpop.f32.mrb[45].mxu0 }
 0xffe   : > { %v2282_v42 = vpop.f32.mrb[46].mxu0 }
 0xfff   : > { %v2285_v43 = vmax.f32 %v2280_v41, 0.0  ;;  %v2734_v0 = vpop.f32.mrb[47].mxu0 }
0x1001   : > { %v2286_v45 = vpack.c.bf16 %v2285_v43, %v2285_v43 }
0x1003   : > { %2744 = vmatmul.mubr.msk.bf16.vlgmr.msra.gmra.mrb[44].mxu1 %vm2319_vm14, %v2286_v45 }
0x10d6   : > { %v2357_v9 = vpop.f32.mrb[44].mxu1 }
0x10d7   : > { %v2363_v48 = vadd.f32 %v2357_v9, %v3446_v10  ;;  %v2745_v49 = vpop.f32.mrb[45].mxu1 }
0x10d8   : > { %v2360_v50 = vpop.f32.mrb[46].mxu1 }
0x10d9   : > { %v2371_v51 = vadd.f32 %v2520_v46, %v2363_v48  ;;  %v2746_v52 = vpop.f32.mrb[47].mxu1 }
0x10db   : > { %2372 = vst.msk [vmem:[%s748_s6] sm:$0xff] %vm770_vm0, %v2371_v51 }
0x10dc   : > { %2883 = shalt.err (!%p2880_p8)
}
0x10dd   : > { %s2884_s30 = scalar_lea.hbm %s3493_s28, 128  ;;  %s2888_s7 = scalar_lea.hbm %s3561_s25, 256 }
0x10de   : > { %p2885_p9 = scmp.ne.s32.totalorder %s3493_s28, %s2884_s30  ;;  %p2889_p0 = scmp.lt.u32.totalorder %s3493_s28, %s3561_s25 }
0x10df   : > { %p2890_p1 = scmp.lt.u32.totalorder %s2888_s7, %s2884_s30  ;;  %p2892_p3 = scmp.lt.u32.totalorder %s2884_s30, %s3493_s28 }
0x10e0   : > { %p2886_p12 = pnand %p2885_p9, %p3118_p10 }
0x10e1   : > { %p2891_p2 = por %p2890_p1, %p2889_p0 }
0x10e2   : > { %p2887_p13 = pneg %p2886_p12 }
0x10e3   : > { %p2893_p4 = por %p2892_p3, %p2891_p2 }
0x10e5   : > { %p2894_p5 = pnand %p2893_p4, %p2887_p13 }
0x10e7   : > { %2897 = shalt.err (!%p2894_p5)
}
0x10e8   : > { %2747 = dma.vmem_to_hbm [thread:$0]  (%p3118_p10), %s3495_s1, 128, %s3493_s28, %s2374_s19  }
0x10e9 PF: > { %p2753_p6 = scmp.ge.s32.totalorder %s2934_s8, 2  ;;  %s2399_s4 = sand.u32 1, %s2922_s3  }
0x10ea   : > { %s2400_s5 = scalar_lea.sflag [#allocation5], %s2399_s4 }
0x10eb   : > { %p2750_p7 = pnand %p2753_p6, %p3122_p11 }
0x10ed   : > { %2917 = dma.done.wait (!%p2750_p7), %s2400_s5, 128  }
0x10ee   : > { %2919 = vsyncadd (!%p2750_p7), %s2400_s5, 4294967168  ;;  %s3623_s8 = sld [smem:[#allocation9_spill]]  ;;  %s3624_s30 = sld [smem:[#allocation8_spill]] }
0x10ef   : > { %s3625_s1 = sld [smem:[#allocation10_spill]]  ;;  %s3626_s3 = smov %s2926_s26 }
0x10f4   : > { %p41_p8 = scmp.ge.s32.totalorder %s3623_s8, 4   ;;  %s3627_s26 = smov %s3624_s30 }
0x10f6   :  { %43 = sbr.rel (!%p41_p8) target bundleno = 30 (0x1e), region = 154 }
0x10fd   :  { %2405 = vsyncpa [#allocation5], 1 }
0x10fe   :  { %2407 = vsyncpa [#allocation5 + $0x1], 1 }

</bundles_post_ra>
